<compile_context>
chip_gen: v7x
topology: tpu7x:2x2x1
jax: 0.10.0
libtpu: 0.0.40
codegen_flags: <defaults>
</compile_context>

<pallas_src>
import functools

import jax
import jax.numpy as jnp
from jax.experimental import pallas as pl
from jax.experimental.pallas import tpu as pltpu


# On v6e/v7x at real DETR sizes (E=256, F=2048, long sequences) set this to
# jnp.bfloat16 to feed the MXU bf16 operands (accumulation stays f32 via
# preferred_element_type; softmax / layernorm math stays f32 regardless).
MATMUL_DTYPE = jnp.float32


def _mm(a, b):
    return jnp.dot(a.astype(MATMUL_DTYPE), b.astype(MATMUL_DTYPE),
                   preferred_element_type=jnp.float32)


# ----------------------------- Fused decoder kernel -------------------------


def _decoder_kernel(
    tgt_ref, mem_ref,
    wqkv_s_ref, bqkv_s_ref, wo_s_ref, bo_s_ref,
    wqkv_c_ref, bqkv_c_ref, wo_c_ref, bo_c_ref,
    w1_ref, b1_ref, w2_ref, b2_ref, ln_ref,
    o_ref,
    *, num_layers, nhead, eps):
    E = wo_s_ref.shape[0]
    dh = E // nhead
    scale = 1.0 / float(dh) ** 0.5

    x = tgt_ref[0].astype(jnp.float32)        # (Lq, E) decoder state (one batch)
    mem = mem_ref[0].astype(jnp.float32)      # (Lk, E) encoder output (one batch)

    # Weights: loaded once per grid step, resident in VMEM/vregs for all layers.
    wqkv_s = wqkv_s_ref[...]
    bqkv_s = bqkv_s_ref[...].astype(jnp.float32)
    wo_s = wo_s_ref[...]
    bo_s = bo_s_ref[...].astype(jnp.float32)
    wqkv_c = wqkv_c_ref[...]
    bqkv_c = bqkv_c_ref[...].astype(jnp.float32)
    wo_c = wo_c_ref[...]
    bo_c = bo_c_ref[...].astype(jnp.float32)
    w1 = w1_ref[...]
    b1 = b1_ref[...].astype(jnp.float32)
    w2 = w2_ref[...]
    b2 = b2_ref[...].astype(jnp.float32)
    ln = ln_ref[...].astype(jnp.float32)      # (6, E): [g1, b1, g2, b2, g3, b3]

    def layer_norm(y, g, b):
        mu = jnp.mean(y, axis=-1, keepdims=True)
        var = jnp.mean((y - mu) ** 2, axis=-1, keepdims=True)
        return (y - mu) * jax.lax.rsqrt(var + eps) * g + b

    def mha_core(q, k, v, wo, bo):
        # q: (Lq, E); k, v: (Lk, E) -- already projected (+bias).
        # Heads handled with static column slices; out-projection is accumulated
        # per head (== out_proj of the concatenated heads), so no concat/reshape.
        o = None
        for h in range(nhead):
            sl = slice(h * dh, (h + 1) * dh)
            qh, kh, vh = q[:, sl], k[:, sl], v[:, sl]
            s = _mm(qh * scale, kh.T)                       # (Lq, Lk)
            # TODO(synk): additive attn_mask / key_padding_mask bias goes here.
            s = s - jnp.max(s, axis=-1, keepdims=True)
            p = jnp.exp(s)
            p = p * pl.reciprocal(jnp.sum(p, axis=-1, keepdims=True), approx=True)
            oh = _mm(p, vh)                                 # (Lq, dh)
            contrib = _mm(oh, wo[sl, :])                    # (Lq, E)
            o = contrib if o is None else o + contrib
        return o + bo

    # Cross-attention K/V depend only on the encoder output and the shared
    # weights: compute once, reuse in every layer.
    kv_m = _mm(mem, wqkv_c[:, E:]) + bqkv_c[:, E:]          # (Lk, 2E)
    k_m, v_m = kv_m[:, :E], kv_m[:, E:]

    for _ in range(num_layers):
        # --- self-attention block (packed QKV: one matmul) ---
        qkv = _mm(x, wqkv_s) + bqkv_s                       # (Lq, 3E)
        sa = mha_core(qkv[:, :E], qkv[:, E:2 * E], qkv[:, 2 * E:], wo_s, bo_s)
        x = layer_norm(x + sa, ln[0:1], ln[1:2])

        # --- cross-attention block ---
        qc = _mm(x, wqkv_c[:, :E]) + bqkv_c[:, :E]          # (Lq, E)
        ca = mha_core(qc, k_m, v_m, wo_c, bo_c)
        x = layer_norm(x + ca, ln[2:3], ln[3:4])

        # --- feed-forward block ---
        hdn = jnp.maximum(_mm(x, w1) + b1, 0.0)             # (Lq, F)
        ff = _mm(hdn, w2) + b2                              # (Lq, E)
        x = layer_norm(x + ff, ln[4:5], ln[5:6])

    # Only HBM store of the whole forward (tiny at these shapes).
    o_ref[0] = x.astype(o_ref.dtype)


# ------------------------------- Wrapper -------------------------------------


def transformer_decoder(embeded_latent, encoder_output, params, nhead, num_layers,
                        eps=1e-5):
    """Fused TransformerDecoder forward.

    embeded_latent: (Lq, B, E), encoder_output: (Lk, B, E) -> (Lq, B, E).
    All layers share one parameter set (PyTorch _get_clones / deepcopy init).
    """
    Lq, B, E = embeded_latent.shape
    Lk = encoder_output.shape[0]
    F = params["w1"].shape[1]

    # Batch-major layout so grid=(B,) can split batches across TensorCores.
    tgt = jnp.transpose(embeded_latent, (1, 0, 2))          # (B, Lq, E)
    mem = jnp.transpose(encoder_output, (1, 0, 2))          # (B, Lk, E)

    def w_spec(shape):
        return pl.BlockSpec(shape, lambda b: (0, 0))

    # TODO(synk): at real DETR dims (E=256, F=2048, long Lk) tile the matmuls
    # (tm/tn/tk multiples of 128, f32 VMEM accumulator, vmem_limit_bytes set
    # explicitly) instead of whole-array weight blocks.
    out = pl.pallas_call(
        functools.partial(_decoder_kernel, num_layers=num_layers, nhead=nhead,
                          eps=eps),
        out_shape=jax.ShapeDtypeStruct((B, Lq, E), embeded_latent.dtype),
        grid=(B,),
        in_specs=[
            pl.BlockSpec((1, Lq, E), lambda b: (b, 0, 0)),
            pl.BlockSpec((1, Lk, E), lambda b: (b, 0, 0)),
            w_spec((E, 3 * E)), w_spec((1, 3 * E)), w_spec((E, E)), w_spec((1, E)),
            w_spec((E, 3 * E)), w_spec((1, 3 * E)), w_spec((E, E)), w_spec((1, E)),
            w_spec((E, F)), w_spec((1, F)), w_spec((F, E)), w_spec((1, E)),
            w_spec((6, E)),
        ],
        out_specs=pl.BlockSpec((1, Lq, E), lambda b: (b, 0, 0)),
        compiler_params=pltpu.CompilerParams(dimension_semantics=("parallel",)),
    )(tgt, mem,
      params["wqkv_s"], params["bqkv_s"], params["wo_s"], params["bo_s"],
      params["wqkv_c"], params["bqkv_c"], params["wo_c"], params["bo_c"],
      params["w1"], params["b1"], params["w2"], params["b2"], params["ln"])

    return jnp.transpose(out, (1, 0, 2))                    # back to (Lq, B, E)


# ------------------------------ Param init ------------------------------------


def init_decoder_params(key, E, F, dtype=jnp.float32):
    """One shared parameter set (PyTorch _get_clones deepcopies identical weights).

    Q/K/V in-projections are packed column-wise into (E, 3E); LayerNorm
    gamma/beta for the 3 norms are packed row-wise into a (6, E) slab.
    """
    ks = jax.random.split(key, 6)
    std_e = 1.0 / (E ** 0.5)
    std_f = 1.0 / (F ** 0.5)
    ln = jnp.concatenate(
        [jnp.ones((1, E), dtype), jnp.zeros((1, E), dtype)] * 3, axis=0)  # (6, E)
    return {
        "wqkv_s": jax.random.normal(ks[0], (E, 3 * E), dtype) * std_e,
        "bqkv_s": jnp.zeros((1, 3 * E), dtype),
        "wo_s": jax.random.normal(ks[1], (E, E), dtype) * std_e,
        "bo_s": jnp.zeros((1, E), dtype),
        "wqkv_c": jax.random.normal(ks[2], (E, 3 * E), dtype) * std_e,
        "bqkv_c": jnp.zeros((1, 3 * E), dtype),
        "wo_c": jax.random.normal(ks[3], (E, E), dtype) * std_e,
        "bo_c": jnp.zeros((1, E), dtype),
        "w1": jax.random.normal(ks[4], (E, F), dtype) * std_e,
        "b1": jnp.zeros((1, F), dtype),
        "w2": jax.random.normal(ks[5], (F, E), dtype) * std_f,
        "b2": jnp.zeros((1, E), dtype),
        "ln": ln,
    }


# --------------------------------- main ---------------------------------------

if __name__ == "__main__":
    num_layers = 2
    d_model = 32
    nhead = 4
    dim_feedforward = 64
    tgt_len, src_len, batch = 8, 16, 2

    key = jax.random.PRNGKey(0)
    k_tgt, k_mem, k_par = jax.random.split(key, 3)

    embeded_latent = jax.random.normal(k_tgt, (tgt_len, batch, d_model), jnp.float32)
    encoder_output = jax.random.normal(k_mem, (src_len, batch, d_model), jnp.float32)
    params = init_decoder_params(k_par, d_model, dim_feedforward)

    fwd = jax.jit(functools.partial(transformer_decoder, nhead=nhead,
                                    num_layers=num_layers))
    out = fwd(embeded_latent, encoder_output, params)
    out = jax.block_until_ready(out)

    assert out.shape == (tgt_len, batch, d_model), out.shape
    assert bool(jnp.all(jnp.isfinite(out)))
    print("KERNEL_OK")
</pallas_src>

<mosaic_0001>
module attributes {stable_mosaic.version = 11 : i64} {
  func.func @_decoder_kernel(%arg0: i32, %arg1: memref<1x8x32xf32, #tpu.memory_space<vmem>>, %arg2: memref<1x16x32xf32, #tpu.memory_space<vmem>>, %arg3: memref<32x96xf32, #tpu.memory_space<vmem>>, %arg4: memref<1x96xf32, #tpu.memory_space<vmem>>, %arg5: memref<32x32xf32, #tpu.memory_space<vmem>>, %arg6: memref<1x32xf32, #tpu.memory_space<vmem>>, %arg7: memref<32x96xf32, #tpu.memory_space<vmem>>, %arg8: memref<1x96xf32, #tpu.memory_space<vmem>>, %arg9: memref<32x32xf32, #tpu.memory_space<vmem>>, %arg10: memref<1x32xf32, #tpu.memory_space<vmem>>, %arg11: memref<32x64xf32, #tpu.memory_space<vmem>>, %arg12: memref<1x64xf32, #tpu.memory_space<vmem>>, %arg13: memref<64x32xf32, #tpu.memory_space<vmem>>, %arg14: memref<1x32xf32, #tpu.memory_space<vmem>>, %arg15: memref<6x32xf32, #tpu.memory_space<vmem>>, %arg16: memref<1x8x32xf32, #tpu.memory_space<vmem>>) attributes {dimension_semantics = [#tpu.dimension_semantics<parallel>], iteration_bounds = array<i64: 2>, scalar_prefetch = 0 : i64, scratch_operands = 0 : i64, tpu.core_type = #tpu.core_type<tc>, window_params = [{transform_indices = @transform_0, window_bounds = array<i64: 1, 8, 32>}, {transform_indices = @transform_1, window_bounds = array<i64: 1, 16, 32>}, {pipeline_mode = #tpu.pipeline_mode<synchronous>, transform_indices = @transform_2, window_bounds = array<i64: 32, 96>}, {pipeline_mode = #tpu.pipeline_mode<synchronous>, transform_indices = @transform_3, window_bounds = array<i64: 1, 96>}, {pipeline_mode = #tpu.pipeline_mode<synchronous>, transform_indices = @transform_4, window_bounds = array<i64: 32, 32>}, {pipeline_mode = #tpu.pipeline_mode<synchronous>, transform_indices = @transform_5, window_bounds = array<i64: 1, 32>}, {pipeline_mode = #tpu.pipeline_mode<synchronous>, transform_indices = @transform_6, window_bounds = array<i64: 32, 96>}, {pipeline_mode = #tpu.pipeline_mode<synchronous>, transform_indices = @transform_7, window_bounds = array<i64: 1, 96>}, {pipeline_mode = #tpu.pipeline_mode<synchronous>, transform_indices = @transform_8, window_bounds = array<i64: 32, 32>}, {pipeline_mode = #tpu.pipeline_mode<synchronous>, transform_indices = @transform_9, window_bounds = array<i64: 1, 32>}, {pipeline_mode = #tpu.pipeline_mode<synchronous>, transform_indices = @transform_10, window_bounds = array<i64: 32, 64>}, {pipeline_mode = #tpu.pipeline_mode<synchronous>, transform_indices = @transform_11, window_bounds = array<i64: 1, 64>}, {pipeline_mode = #tpu.pipeline_mode<synchronous>, transform_indices = @transform_12, window_bounds = array<i64: 64, 32>}, {pipeline_mode = #tpu.pipeline_mode<synchronous>, transform_indices = @transform_13, window_bounds = array<i64: 1, 32>}, {pipeline_mode = #tpu.pipeline_mode<synchronous>, transform_indices = @transform_14, window_bounds = array<i64: 6, 32>}, {transform_indices = @transform_15, window_bounds = array<i64: 1, 8, 32>}]} {
    %c0 = arith.constant 0 : index
    %c0_0 = arith.constant 0 : index
    %c0_1 = arith.constant 0 : index
    %0 = vector.load %arg1[%c0, %c0_0, %c0_1] : memref<1x8x32xf32, #tpu.memory_space<vmem>>, vector<1x8x32xf32>
    %1 = vector.shape_cast %0 : vector<1x8x32xf32> to vector<8x32xf32>
    %c0_2 = arith.constant 0 : index
    %c0_3 = arith.constant 0 : index
    %c0_4 = arith.constant 0 : index
    %2 = vector.load %arg2[%c0_2, %c0_3, %c0_4] : memref<1x16x32xf32, #tpu.memory_space<vmem>>, vector<1x16x32xf32>
    %3 = vector.shape_cast %2 : vector<1x16x32xf32> to vector<16x32xf32>
    %c0_5 = arith.constant 0 : index
    %c0_6 = arith.constant 0 : index
    %4 = vector.load %arg3[%c0_5, %c0_6] : memref<32x96xf32, #tpu.memory_space<vmem>>, vector<32x96xf32>
    %c0_7 = arith.constant 0 : index
    %c0_8 = arith.constant 0 : index
    %5 = vector.load %arg4[%c0_7, %c0_8] : memref<1x96xf32, #tpu.memory_space<vmem>>, vector<1x96xf32>
    %c0_9 = arith.constant 0 : index
    %c0_10 = arith.constant 0 : index
    %6 = vector.load %arg5[%c0_9, %c0_10] : memref<32x32xf32, #tpu.memory_space<vmem>>, vector<32x32xf32>
    %c0_11 = arith.constant 0 : index
    %c0_12 = arith.constant 0 : index
    %7 = vector.load %arg6[%c0_11, %c0_12] : memref<1x32xf32, #tpu.memory_space<vmem>>, vector<1x32xf32>
    %c0_13 = arith.constant 0 : index
    %c0_14 = arith.constant 0 : index
    %8 = vector.load %arg7[%c0_13, %c0_14] : memref<32x96xf32, #tpu.memory_space<vmem>>, vector<32x96xf32>
    %c0_15 = arith.constant 0 : index
    %c0_16 = arith.constant 0 : index
    %9 = vector.load %arg8[%c0_15, %c0_16] : memref<1x96xf32, #tpu.memory_space<vmem>>, vector<1x96xf32>
    %c0_17 = arith.constant 0 : index
    %c0_18 = arith.constant 0 : index
    %10 = vector.load %arg9[%c0_17, %c0_18] : memref<32x32xf32, #tpu.memory_space<vmem>>, vector<32x32xf32>
    %c0_19 = arith.constant 0 : index
    %c0_20 = arith.constant 0 : index
    %11 = vector.load %arg10[%c0_19, %c0_20] : memref<1x32xf32, #tpu.memory_space<vmem>>, vector<1x32xf32>
    %c0_21 = arith.constant 0 : index
    %c0_22 = arith.constant 0 : index
    %12 = vector.load %arg11[%c0_21, %c0_22] : memref<32x64xf32, #tpu.memory_space<vmem>>, vector<32x64xf32>
    %c0_23 = arith.constant 0 : index
    %c0_24 = arith.constant 0 : index
    %13 = vector.load %arg12[%c0_23, %c0_24] : memref<1x64xf32, #tpu.memory_space<vmem>>, vector<1x64xf32>
    %c0_25 = arith.constant 0 : index
    %c0_26 = arith.constant 0 : index
    %14 = vector.load %arg13[%c0_25, %c0_26] : memref<64x32xf32, #tpu.memory_space<vmem>>, vector<64x32xf32>
    %c0_27 = arith.constant 0 : index
    %c0_28 = arith.constant 0 : index
    %15 = vector.load %arg14[%c0_27, %c0_28] : memref<1x32xf32, #tpu.memory_space<vmem>>, vector<1x32xf32>
    %c0_29 = arith.constant 0 : index
    %c0_30 = arith.constant 0 : index
    %16 = vector.load %arg15[%c0_29, %c0_30] : memref<6x32xf32, #tpu.memory_space<vmem>>, vector<6x32xf32>
    %17 = vector.extract_strided_slice %8 {offsets = [0, 32], sizes = [32, 64], strides = [1, 1]} : vector<32x96xf32> to vector<32x64xf32>
    %cst = arith.constant dense<0.000000e+00> : vector<16x64xf32>
    %18 = tpu.matmul %3, %17, %cst {dimension_numbers = #tpu.dot_dimension_numbers<[1], [0], [0], [1], [0, 0, 1, 1], [], []>} : vector<16x32xf32>, vector<32x64xf32>, vector<16x64xf32> -> vector<16x64xf32>
    %19 = vector.extract_strided_slice %9 {offsets = [0, 32], sizes = [1, 64], strides = [1, 1]} : vector<1x96xf32> to vector<1x64xf32>
    %20 = vector.broadcast %19 : vector<1x64xf32> to vector<16x64xf32>
    %21 = arith.addf %18, %20 : vector<16x64xf32>
    %22 = vector.extract_strided_slice %21 {offsets = [0, 0], sizes = [16, 32], strides = [1, 1]} : vector<16x64xf32> to vector<16x32xf32>
    %23 = vector.extract_strided_slice %21 {offsets = [0, 32], sizes = [16, 32], strides = [1, 1]} : vector<16x64xf32> to vector<16x32xf32>
    %cst_31 = arith.constant dense<0.000000e+00> : vector<8x96xf32>
    %24 = tpu.matmul %1, %4, %cst_31 {dimension_numbers = #tpu.dot_dimension_numbers<[1], [0], [0], [1], [0, 0, 1, 1], [], []>} : vector<8x32xf32>, vector<32x96xf32>, vector<8x96xf32> -> vector<8x96xf32>
    %25 = vector.broadcast %5 : vector<1x96xf32> to vector<8x96xf32>
    %26 = arith.addf %24, %25 : vector<8x96xf32>
    %27 = vector.extract_strided_slice %26 {offsets = [0, 0], sizes = [8, 32], strides = [1, 1]} : vector<8x96xf32> to vector<8x32xf32>
    %28 = vector.extract_strided_slice %26 {offsets = [0, 32], sizes = [8, 32], strides = [1, 1]} : vector<8x96xf32> to vector<8x32xf32>
    %29 = vector.extract_strided_slice %26 {offsets = [0, 64], sizes = [8, 32], strides = [1, 1]} : vector<8x96xf32> to vector<8x32xf32>
    %30 = vector.extract_strided_slice %27 {offsets = [0, 0], sizes = [8, 8], strides = [1, 1]} : vector<8x32xf32> to vector<8x8xf32>
    %31 = vector.extract_strided_slice %28 {offsets = [0, 0], sizes = [8, 8], strides = [1, 1]} : vector<8x32xf32> to vector<8x8xf32>
    %32 = vector.extract_strided_slice %29 {offsets = [0, 0], sizes = [8, 8], strides = [1, 1]} : vector<8x32xf32> to vector<8x8xf32>
    %cst_32 = arith.constant 0.353553385 : f32
    %33 = vector.broadcast %cst_32 : f32 to vector<8x8xf32>
    %34 = arith.mulf %30, %33 : vector<8x8xf32>
    %35 = tpu.transpose %31, [1, 0] : vector<8x8xf32> -> vector<8x8xf32>
    %cst_33 = arith.constant dense<0.000000e+00> : vector<8x8xf32>
    %36 = tpu.matmul %34, %35, %cst_33 {dimension_numbers = #tpu.dot_dimension_numbers<[1], [0], [0], [1], [0, 0, 1, 1], [], []>} : vector<8x8xf32>, vector<8x8xf32>, vector<8x8xf32> -> vector<8x8xf32>
    %cst_34 = arith.constant dense<0xFF800000> : vector<8xf32>
    %37 = vector.multi_reduction <maximumf>, %36, %cst_34 [1] : vector<8x8xf32> to vector<8xf32>
    %38 = vector.shape_cast %37 : vector<8xf32> to vector<8x1xf32>
    %39 = vector.broadcast %38 : vector<8x1xf32> to vector<8x8xf32>
    %40 = arith.subf %36, %39 : vector<8x8xf32>
    %41 = math.exp %40 : vector<8x8xf32>
    %cst_35 = arith.constant dense<0.000000e+00> : vector<8xf32>
    %42 = vector.multi_reduction <add>, %41, %cst_35 [1] : vector<8x8xf32> to vector<8xf32>
    %43 = vector.shape_cast %42 : vector<8xf32> to vector<8x1xf32>
    %44 = tpu.reciprocal %43 {approx = true} : vector<8x1xf32> -> vector<8x1xf32>
    %45 = vector.broadcast %44 : vector<8x1xf32> to vector<8x8xf32>
    %46 = arith.mulf %41, %45 : vector<8x8xf32>
    %cst_36 = arith.constant dense<0.000000e+00> : vector<8x8xf32>
    %47 = tpu.matmul %46, %32, %cst_36 {dimension_numbers = #tpu.dot_dimension_numbers<[1], [0], [0], [1], [0, 0, 1, 1], [], []>} : vector<8x8xf32>, vector<8x8xf32>, vector<8x8xf32> -> vector<8x8xf32>
    %48 = vector.extract_strided_slice %6 {offsets = [0, 0], sizes = [8, 32], strides = [1, 1]} : vector<32x32xf32> to vector<8x32xf32>
    %cst_37 = arith.constant dense<0.000000e+00> : vector<8x32xf32>
    %49 = tpu.matmul %47, %48, %cst_37 {dimension_numbers = #tpu.dot_dimension_numbers<[1], [0], [0], [1], [0, 0, 1, 1], [], []>} : vector<8x8xf32>, vector<8x32xf32>, vector<8x32xf32> -> vector<8x32xf32>
    %50 = vector.extract_strided_slice %27 {offsets = [0, 8], sizes = [8, 8], strides = [1, 1]} : vector<8x32xf32> to vector<8x8xf32>
    %51 = vector.extract_strided_slice %28 {offsets = [0, 8], sizes = [8, 8], strides = [1, 1]} : vector<8x32xf32> to vector<8x8xf32>
    %52 = vector.extract_strided_slice %29 {offsets = [0, 8], sizes = [8, 8], strides = [1, 1]} : vector<8x32xf32> to vector<8x8xf32>
    %cst_38 = arith.constant 0.353553385 : f32
    %53 = vector.broadcast %cst_38 : f32 to vector<8x8xf32>
    %54 = arith.mulf %50, %53 : vector<8x8xf32>
    %55 = tpu.transpose %51, [1, 0] : vector<8x8xf32> -> vector<8x8xf32>
    %cst_39 = arith.constant dense<0.000000e+00> : vector<8x8xf32>
    %56 = tpu.matmul %54, %55, %cst_39 {dimension_numbers = #tpu.dot_dimension_numbers<[1], [0], [0], [1], [0, 0, 1, 1], [], []>} : vector<8x8xf32>, vector<8x8xf32>, vector<8x8xf32> -> vector<8x8xf32>
    %cst_40 = arith.constant dense<0xFF800000> : vector<8xf32>
    %57 = vector.multi_reduction <maximumf>, %56, %cst_40 [1] : vector<8x8xf32> to vector<8xf32>
    %58 = vector.shape_cast %57 : vector<8xf32> to vector<8x1xf32>
    %59 = vector.broadcast %58 : vector<8x1xf32> to vector<8x8xf32>
    %60 = arith.subf %56, %59 : vector<8x8xf32>
    %61 = math.exp %60 : vector<8x8xf32>
    %cst_41 = arith.constant dense<0.000000e+00> : vector<8xf32>
    %62 = vector.multi_reduction <add>, %61, %cst_41 [1] : vector<8x8xf32> to vector<8xf32>
    %63 = vector.shape_cast %62 : vector<8xf32> to vector<8x1xf32>
    %64 = tpu.reciprocal %63 {approx = true} : vector<8x1xf32> -> vector<8x1xf32>
    %65 = vector.broadcast %64 : vector<8x1xf32> to vector<8x8xf32>
    %66 = arith.mulf %61, %65 : vector<8x8xf32>
    %cst_42 = arith.constant dense<0.000000e+00> : vector<8x8xf32>
    %67 = tpu.matmul %66, %52, %cst_42 {dimension_numbers = #tpu.dot_dimension_numbers<[1], [0], [0], [1], [0, 0, 1, 1], [], []>} : vector<8x8xf32>, vector<8x8xf32>, vector<8x8xf32> -> vector<8x8xf32>
    %68 = vector.extract_strided_slice %6 {offsets = [8, 0], sizes = [8, 32], strides = [1, 1]} : vector<32x32xf32> to vector<8x32xf32>
    %cst_43 = arith.constant dense<0.000000e+00> : vector<8x32xf32>
    %69 = tpu.matmul %67, %68, %cst_43 {dimension_numbers = #tpu.dot_dimension_numbers<[1], [0], [0], [1], [0, 0, 1, 1], [], []>} : vector<8x8xf32>, vector<8x32xf32>, vector<8x32xf32> -> vector<8x32xf32>
    %70 = arith.addf %49, %69 : vector<8x32xf32>
    %71 = vector.extract_strided_slice %27 {offsets = [0, 16], sizes = [8, 8], strides = [1, 1]} : vector<8x32xf32> to vector<8x8xf32>
    %72 = vector.extract_strided_slice %28 {offsets = [0, 16], sizes = [8, 8], strides = [1, 1]} : vector<8x32xf32> to vector<8x8xf32>
    %73 = vector.extract_strided_slice %29 {offsets = [0, 16], sizes = [8, 8], strides = [1, 1]} : vector<8x32xf32> to vector<8x8xf32>
    %cst_44 = arith.constant 0.353553385 : f32
    %74 = vector.broadcast %cst_44 : f32 to vector<8x8xf32>
    %75 = arith.mulf %71, %74 : vector<8x8xf32>
    %76 = tpu.transpose %72, [1, 0] : vector<8x8xf32> -> vector<8x8xf32>
    %cst_45 = arith.constant dense<0.000000e+00> : vector<8x8xf32>
    %77 = tpu.matmul %75, %76, %cst_45 {dimension_numbers = #tpu.dot_dimension_numbers<[1], [0], [0], [1], [0, 0, 1, 1], [], []>} : vector<8x8xf32>, vector<8x8xf32>, vector<8x8xf32> -> vector<8x8xf32>
    %cst_46 = arith.constant dense<0xFF800000> : vector<8xf32>
    %78 = vector.multi_reduction <maximumf>, %77, %cst_46 [1] : vector<8x8xf32> to vector<8xf32>
    %79 = vector.shape_cast %78 : vector<8xf32> to vector<8x1xf32>
    %80 = vector.broadcast %79 : vector<8x1xf32> to vector<8x8xf32>
    %81 = arith.subf %77, %80 : vector<8x8xf32>
    %82 = math.exp %81 : vector<8x8xf32>
    %cst_47 = arith.constant dense<0.000000e+00> : vector<8xf32>
    %83 = vector.multi_reduction <add>, %82, %cst_47 [1] : vector<8x8xf32> to vector<8xf32>
    %84 = vector.shape_cast %83 : vector<8xf32> to vector<8x1xf32>
    %85 = tpu.reciprocal %84 {approx = true} : vector<8x1xf32> -> vector<8x1xf32>
    %86 = vector.broadcast %85 : vector<8x1xf32> to vector<8x8xf32>
    %87 = arith.mulf %82, %86 : vector<8x8xf32>
    %cst_48 = arith.constant dense<0.000000e+00> : vector<8x8xf32>
    %88 = tpu.matmul %87, %73, %cst_48 {dimension_numbers = #tpu.dot_dimension_numbers<[1], [0], [0], [1], [0, 0, 1, 1], [], []>} : vector<8x8xf32>, vector<8x8xf32>, vector<8x8xf32> -> vector<8x8xf32>
    %89 = vector.extract_strided_slice %6 {offsets = [16, 0], sizes = [8, 32], strides = [1, 1]} : vector<32x32xf32> to vector<8x32xf32>
    %cst_49 = arith.constant dense<0.000000e+00> : vector<8x32xf32>
    %90 = tpu.matmul %88, %89, %cst_49 {dimension_numbers = #tpu.dot_dimension_numbers<[1], [0], [0], [1], [0, 0, 1, 1], [], []>} : vector<8x8xf32>, vector<8x32xf32>, vector<8x32xf32> -> vector<8x32xf32>
    %91 = arith.addf %70, %90 : vector<8x32xf32>
    %92 = vector.extract_strided_slice %27 {offsets = [0, 24], sizes = [8, 8], strides = [1, 1]} : vector<8x32xf32> to vector<8x8xf32>
    %93 = vector.extract_strided_slice %28 {offsets = [0, 24], sizes = [8, 8], strides = [1, 1]} : vector<8x32xf32> to vector<8x8xf32>
    %94 = vector.extract_strided_slice %29 {offsets = [0, 24], sizes = [8, 8], strides = [1, 1]} : vector<8x32xf32> to vector<8x8xf32>
    %cst_50 = arith.constant 0.353553385 : f32
    %95 = vector.broadcast %cst_50 : f32 to vector<8x8xf32>
    %96 = arith.mulf %92, %95 : vector<8x8xf32>
    %97 = tpu.transpose %93, [1, 0] : vector<8x8xf32> -> vector<8x8xf32>
    %cst_51 = arith.constant dense<0.000000e+00> : vector<8x8xf32>
    %98 = tpu.matmul %96, %97, %cst_51 {dimension_numbers = #tpu.dot_dimension_numbers<[1], [0], [0], [1], [0, 0, 1, 1], [], []>} : vector<8x8xf32>, vector<8x8xf32>, vector<8x8xf32> -> vector<8x8xf32>
    %cst_52 = arith.constant dense<0xFF800000> : vector<8xf32>
    %99 = vector.multi_reduction <maximumf>, %98, %cst_52 [1] : vector<8x8xf32> to vector<8xf32>
    %100 = vector.shape_cast %99 : vector<8xf32> to vector<8x1xf32>
    %101 = vector.broadcast %100 : vector<8x1xf32> to vector<8x8xf32>
    %102 = arith.subf %98, %101 : vector<8x8xf32>
    %103 = math.exp %102 : vector<8x8xf32>
    %cst_53 = arith.constant dense<0.000000e+00> : vector<8xf32>
    %104 = vector.multi_reduction <add>, %103, %cst_53 [1] : vector<8x8xf32> to vector<8xf32>
    %105 = vector.shape_cast %104 : vector<8xf32> to vector<8x1xf32>
    %106 = tpu.reciprocal %105 {approx = true} : vector<8x1xf32> -> vector<8x1xf32>
    %107 = vector.broadcast %106 : vector<8x1xf32> to vector<8x8xf32>
    %108 = arith.mulf %103, %107 : vector<8x8xf32>
    %cst_54 = arith.constant dense<0.000000e+00> : vector<8x8xf32>
    %109 = tpu.matmul %108, %94, %cst_54 {dimension_numbers = #tpu.dot_dimension_numbers<[1], [0], [0], [1], [0, 0, 1, 1], [], []>} : vector<8x8xf32>, vector<8x8xf32>, vector<8x8xf32> -> vector<8x8xf32>
    %110 = vector.extract_strided_slice %6 {offsets = [24, 0], sizes = [8, 32], strides = [1, 1]} : vector<32x32xf32> to vector<8x32xf32>
    %cst_55 = arith.constant dense<0.000000e+00> : vector<8x32xf32>
    %111 = tpu.matmul %109, %110, %cst_55 {dimension_numbers = #tpu.dot_dimension_numbers<[1], [0], [0], [1], [0, 0, 1, 1], [], []>} : vector<8x8xf32>, vector<8x32xf32>, vector<8x32xf32> -> vector<8x32xf32>
    %112 = arith.addf %91, %111 : vector<8x32xf32>
    %113 = vector.broadcast %7 : vector<1x32xf32> to vector<8x32xf32>
    %114 = arith.addf %112, %113 : vector<8x32xf32>
    %115 = arith.addf %1, %114 : vector<8x32xf32>
    %116 = vector.extract_strided_slice %16 {offsets = [0, 0], sizes = [1, 32], strides = [1, 1]} : vector<6x32xf32> to vector<1x32xf32>
    %117 = vector.extract_strided_slice %16 {offsets = [1, 0], sizes = [1, 32], strides = [1, 1]} : vector<6x32xf32> to vector<1x32xf32>
    %cst_56 = arith.constant dense<0.000000e+00> : vector<8xf32>
    %118 = vector.multi_reduction <add>, %115, %cst_56 [1] : vector<8x32xf32> to vector<8xf32>
    %119 = vector.shape_cast %118 : vector<8xf32> to vector<8x1xf32>
    %cst_57 = arith.constant 3.200000e+01 : f32
    %120 = vector.broadcast %cst_57 : f32 to vector<8x1xf32>
    %121 = arith.divf %119, %120 : vector<8x1xf32>
    %122 = vector.broadcast %121 : vector<8x1xf32> to vector<8x32xf32>
    %123 = arith.subf %115, %122 : vector<8x32xf32>
    %124 = arith.mulf %123, %123 : vector<8x32xf32>
    %cst_58 = arith.constant dense<0.000000e+00> : vector<8xf32>
    %125 = vector.multi_reduction <add>, %124, %cst_58 [1] : vector<8x32xf32> to vector<8xf32>
    %126 = vector.shape_cast %125 : vector<8xf32> to vector<8x1xf32>
    %cst_59 = arith.constant 3.200000e+01 : f32
    %127 = vector.broadcast %cst_59 : f32 to vector<8x1xf32>
    %128 = arith.divf %126, %127 : vector<8x1xf32>
    %129 = vector.broadcast %121 : vector<8x1xf32> to vector<8x32xf32>
    %130 = arith.subf %115, %129 : vector<8x32xf32>
    %cst_60 = arith.constant 9.99999974E-6 : f32
    %131 = vector.broadcast %cst_60 : f32 to vector<8x1xf32>
    %132 = arith.addf %128, %131 : vector<8x1xf32>
    %133 = math.rsqrt %132 : vector<8x1xf32>
    %134 = vector.broadcast %133 : vector<8x1xf32> to vector<8x32xf32>
    %135 = arith.mulf %130, %134 : vector<8x32xf32>
    %136 = vector.broadcast %116 : vector<1x32xf32> to vector<8x32xf32>
    %137 = arith.mulf %135, %136 : vector<8x32xf32>
    %138 = vector.broadcast %117 : vector<1x32xf32> to vector<8x32xf32>
    %139 = arith.addf %137, %138 : vector<8x32xf32>
    %140 = vector.extract_strided_slice %8 {offsets = [0, 0], sizes = [32, 32], strides = [1, 1]} : vector<32x96xf32> to vector<32x32xf32>
    %cst_61 = arith.constant dense<0.000000e+00> : vector<8x32xf32>
    %141 = tpu.matmul %139, %140, %cst_61 {dimension_numbers = #tpu.dot_dimension_numbers<[1], [0], [0], [1], [0, 0, 1, 1], [], []>} : vector<8x32xf32>, vector<32x32xf32>, vector<8x32xf32> -> vector<8x32xf32>
    %142 = vector.extract_strided_slice %9 {offsets = [0, 0], sizes = [1, 32], strides = [1, 1]} : vector<1x96xf32> to vector<1x32xf32>
    %143 = vector.broadcast %142 : vector<1x32xf32> to vector<8x32xf32>
    %144 = arith.addf %141, %143 : vector<8x32xf32>
    %145 = vector.extract_strided_slice %144 {offsets = [0, 0], sizes = [8, 8], strides = [1, 1]} : vector<8x32xf32> to vector<8x8xf32>
    %146 = vector.extract_strided_slice %22 {offsets = [0, 0], sizes = [16, 8], strides = [1, 1]} : vector<16x32xf32> to vector<16x8xf32>
    %147 = vector.extract_strided_slice %23 {offsets = [0, 0], sizes = [16, 8], strides = [1, 1]} : vector<16x32xf32> to vector<16x8xf32>
    %cst_62 = arith.constant 0.353553385 : f32
    %148 = vector.broadcast %cst_62 : f32 to vector<8x8xf32>
    %149 = arith.mulf %145, %148 : vector<8x8xf32>
    %150 = tpu.transpose %146, [1, 0] : vector<16x8xf32> -> vector<8x16xf32>
    %cst_63 = arith.constant dense<0.000000e+00> : vector<8x16xf32>
    %151 = tpu.matmul %149, %150, %cst_63 {dimension_numbers = #tpu.dot_dimension_numbers<[1], [0], [0], [1], [0, 0, 1, 1], [], []>} : vector<8x8xf32>, vector<8x16xf32>, vector<8x16xf32> -> vector<8x16xf32>
    %cst_64 = arith.constant dense<0xFF800000> : vector<8xf32>
    %152 = vector.multi_reduction <maximumf>, %151, %cst_64 [1] : vector<8x16xf32> to vector<8xf32>
    %153 = vector.shape_cast %152 : vector<8xf32> to vector<8x1xf32>
    %154 = vector.broadcast %153 : vector<8x1xf32> to vector<8x16xf32>
    %155 = arith.subf %151, %154 : vector<8x16xf32>
    %156 = math.exp %155 : vector<8x16xf32>
    %cst_65 = arith.constant dense<0.000000e+00> : vector<8xf32>
    %157 = vector.multi_reduction <add>, %156, %cst_65 [1] : vector<8x16xf32> to vector<8xf32>
    %158 = vector.shape_cast %157 : vector<8xf32> to vector<8x1xf32>
    %159 = tpu.reciprocal %158 {approx = true} : vector<8x1xf32> -> vector<8x1xf32>
    %160 = vector.broadcast %159 : vector<8x1xf32> to vector<8x16xf32>
    %161 = arith.mulf %156, %160 : vector<8x16xf32>
    %cst_66 = arith.constant dense<0.000000e+00> : vector<8x8xf32>
    %162 = tpu.matmul %161, %147, %cst_66 {dimension_numbers = #tpu.dot_dimension_numbers<[1], [0], [0], [1], [0, 0, 1, 1], [], []>} : vector<8x16xf32>, vector<16x8xf32>, vector<8x8xf32> -> vector<8x8xf32>
    %163 = vector.extract_strided_slice %10 {offsets = [0, 0], sizes = [8, 32], strides = [1, 1]} : vector<32x32xf32> to vector<8x32xf32>
    %cst_67 = arith.constant dense<0.000000e+00> : vector<8x32xf32>
    %164 = tpu.matmul %162, %163, %cst_67 {dimension_numbers = #tpu.dot_dimension_numbers<[1], [0], [0], [1], [0, 0, 1, 1], [], []>} : vector<8x8xf32>, vector<8x32xf32>, vector<8x32xf32> -> vector<8x32xf32>
    %165 = vector.extract_strided_slice %144 {offsets = [0, 8], sizes = [8, 8], strides = [1, 1]} : vector<8x32xf32> to vector<8x8xf32>
    %166 = vector.extract_strided_slice %22 {offsets = [0, 8], sizes = [16, 8], strides = [1, 1]} : vector<16x32xf32> to vector<16x8xf32>
    %167 = vector.extract_strided_slice %23 {offsets = [0, 8], sizes = [16, 8], strides = [1, 1]} : vector<16x32xf32> to vector<16x8xf32>
    %cst_68 = arith.constant 0.353553385 : f32
    %168 = vector.broadcast %cst_68 : f32 to vector<8x8xf32>
    %169 = arith.mulf %165, %168 : vector<8x8xf32>
    %170 = tpu.transpose %166, [1, 0] : vector<16x8xf32> -> vector<8x16xf32>
    %cst_69 = arith.constant dense<0.000000e+00> : vector<8x16xf32>
    %171 = tpu.matmul %169, %170, %cst_69 {dimension_numbers = #tpu.dot_dimension_numbers<[1], [0], [0], [1], [0, 0, 1, 1], [], []>} : vector<8x8xf32>, vector<8x16xf32>, vector<8x16xf32> -> vector<8x16xf32>
    %cst_70 = arith.constant dense<0xFF800000> : vector<8xf32>
    %172 = vector.multi_reduction <maximumf>, %171, %cst_70 [1] : vector<8x16xf32> to vector<8xf32>
    %173 = vector.shape_cast %172 : vector<8xf32> to vector<8x1xf32>
    %174 = vector.broadcast %173 : vector<8x1xf32> to vector<8x16xf32>
    %175 = arith.subf %171, %174 : vector<8x16xf32>
    %176 = math.exp %175 : vector<8x16xf32>
    %cst_71 = arith.constant dense<0.000000e+00> : vector<8xf32>
    %177 = vector.multi_reduction <add>, %176, %cst_71 [1] : vector<8x16xf32> to vector<8xf32>
    %178 = vector.shape_cast %177 : vector<8xf32> to vector<8x1xf32>
    %179 = tpu.reciprocal %178 {approx = true} : vector<8x1xf32> -> vector<8x1xf32>
    %180 = vector.broadcast %179 : vector<8x1xf32> to vector<8x16xf32>
    %181 = arith.mulf %176, %180 : vector<8x16xf32>
    %cst_72 = arith.constant dense<0.000000e+00> : vector<8x8xf32>
    %182 = tpu.matmul %181, %167, %cst_72 {dimension_numbers = #tpu.dot_dimension_numbers<[1], [0], [0], [1], [0, 0, 1, 1], [], []>} : vector<8x16xf32>, vector<16x8xf32>, vector<8x8xf32> -> vector<8x8xf32>
    %183 = vector.extract_strided_slice %10 {offsets = [8, 0], sizes = [8, 32], strides = [1, 1]} : vector<32x32xf32> to vector<8x32xf32>
    %cst_73 = arith.constant dense<0.000000e+00> : vector<8x32xf32>
    %184 = tpu.matmul %182, %183, %cst_73 {dimension_numbers = #tpu.dot_dimension_numbers<[1], [0], [0], [1], [0, 0, 1, 1], [], []>} : vector<8x8xf32>, vector<8x32xf32>, vector<8x32xf32> -> vector<8x32xf32>
    %185 = arith.addf %164, %184 : vector<8x32xf32>
    %186 = vector.extract_strided_slice %144 {offsets = [0, 16], sizes = [8, 8], strides = [1, 1]} : vector<8x32xf32> to vector<8x8xf32>
    %187 = vector.extract_strided_slice %22 {offsets = [0, 16], sizes = [16, 8], strides = [1, 1]} : vector<16x32xf32> to vector<16x8xf32>
    %188 = vector.extract_strided_slice %23 {offsets = [0, 16], sizes = [16, 8], strides = [1, 1]} : vector<16x32xf32> to vector<16x8xf32>
    %cst_74 = arith.constant 0.353553385 : f32
    %189 = vector.broadcast %cst_74 : f32 to vector<8x8xf32>
    %190 = arith.mulf %186, %189 : vector<8x8xf32>
    %191 = tpu.transpose %187, [1, 0] : vector<16x8xf32> -> vector<8x16xf32>
    %cst_75 = arith.constant dense<0.000000e+00> : vector<8x16xf32>
    %192 = tpu.matmul %190, %191, %cst_75 {dimension_numbers = #tpu.dot_dimension_numbers<[1], [0], [0], [1], [0, 0, 1, 1], [], []>} : vector<8x8xf32>, vector<8x16xf32>, vector<8x16xf32> -> vector<8x16xf32>
    %cst_76 = arith.constant dense<0xFF800000> : vector<8xf32>
    %193 = vector.multi_reduction <maximumf>, %192, %cst_76 [1] : vector<8x16xf32> to vector<8xf32>
    %194 = vector.shape_cast %193 : vector<8xf32> to vector<8x1xf32>
    %195 = vector.broadcast %194 : vector<8x1xf32> to vector<8x16xf32>
    %196 = arith.subf %192, %195 : vector<8x16xf32>
    %197 = math.exp %196 : vector<8x16xf32>
    %cst_77 = arith.constant dense<0.000000e+00> : vector<8xf32>
    %198 = vector.multi_reduction <add>, %197, %cst_77 [1] : vector<8x16xf32> to vector<8xf32>
    %199 = vector.shape_cast %198 : vector<8xf32> to vector<8x1xf32>
    %200 = tpu.reciprocal %199 {approx = true} : vector<8x1xf32> -> vector<8x1xf32>
    %201 = vector.broadcast %200 : vector<8x1xf32> to vector<8x16xf32>
    %202 = arith.mulf %197, %201 : vector<8x16xf32>
    %cst_78 = arith.constant dense<0.000000e+00> : vector<8x8xf32>
    %203 = tpu.matmul %202, %188, %cst_78 {dimension_numbers = #tpu.dot_dimension_numbers<[1], [0], [0], [1], [0, 0, 1, 1], [], []>} : vector<8x16xf32>, vector<16x8xf32>, vector<8x8xf32> -> vector<8x8xf32>
    %204 = vector.extract_strided_slice %10 {offsets = [16, 0], sizes = [8, 32], strides = [1, 1]} : vector<32x32xf32> to vector<8x32xf32>
    %cst_79 = arith.constant dense<0.000000e+00> : vector<8x32xf32>
    %205 = tpu.matmul %203, %204, %cst_79 {dimension_numbers = #tpu.dot_dimension_numbers<[1], [0], [0], [1], [0, 0, 1, 1], [], []>} : vector<8x8xf32>, vector<8x32xf32>, vector<8x32xf32> -> vector<8x32xf32>
    %206 = arith.addf %185, %205 : vector<8x32xf32>
    %207 = vector.extract_strided_slice %144 {offsets = [0, 24], sizes = [8, 8], strides = [1, 1]} : vector<8x32xf32> to vector<8x8xf32>
    %208 = vector.extract_strided_slice %22 {offsets = [0, 24], sizes = [16, 8], strides = [1, 1]} : vector<16x32xf32> to vector<16x8xf32>
    %209 = vector.extract_strided_slice %23 {offsets = [0, 24], sizes = [16, 8], strides = [1, 1]} : vector<16x32xf32> to vector<16x8xf32>
    %cst_80 = arith.constant 0.353553385 : f32
    %210 = vector.broadcast %cst_80 : f32 to vector<8x8xf32>
    %211 = arith.mulf %207, %210 : vector<8x8xf32>
    %212 = tpu.transpose %208, [1, 0] : vector<16x8xf32> -> vector<8x16xf32>
    %cst_81 = arith.constant dense<0.000000e+00> : vector<8x16xf32>
    %213 = tpu.matmul %211, %212, %cst_81 {dimension_numbers = #tpu.dot_dimension_numbers<[1], [0], [0], [1], [0, 0, 1, 1], [], []>} : vector<8x8xf32>, vector<8x16xf32>, vector<8x16xf32> -> vector<8x16xf32>
    %cst_82 = arith.constant dense<0xFF800000> : vector<8xf32>
    %214 = vector.multi_reduction <maximumf>, %213, %cst_82 [1] : vector<8x16xf32> to vector<8xf32>
    %215 = vector.shape_cast %214 : vector<8xf32> to vector<8x1xf32>
    %216 = vector.broadcast %215 : vector<8x1xf32> to vector<8x16xf32>
    %217 = arith.subf %213, %216 : vector<8x16xf32>
    %218 = math.exp %217 : vector<8x16xf32>
    %cst_83 = arith.constant dense<0.000000e+00> : vector<8xf32>
    %219 = vector.multi_reduction <add>, %218, %cst_83 [1] : vector<8x16xf32> to vector<8xf32>
    %220 = vector.shape_cast %219 : vector<8xf32> to vector<8x1xf32>
    %221 = tpu.reciprocal %220 {approx = true} : vector<8x1xf32> -> vector<8x1xf32>
    %222 = vector.broadcast %221 : vector<8x1xf32> to vector<8x16xf32>
    %223 = arith.mulf %218, %222 : vector<8x16xf32>
    %cst_84 = arith.constant dense<0.000000e+00> : vector<8x8xf32>
    %224 = tpu.matmul %223, %209, %cst_84 {dimension_numbers = #tpu.dot_dimension_numbers<[1], [0], [0], [1], [0, 0, 1, 1], [], []>} : vector<8x16xf32>, vector<16x8xf32>, vector<8x8xf32> -> vector<8x8xf32>
    %225 = vector.extract_strided_slice %10 {offsets = [24, 0], sizes = [8, 32], strides = [1, 1]} : vector<32x32xf32> to vector<8x32xf32>
    %cst_85 = arith.constant dense<0.000000e+00> : vector<8x32xf32>
    %226 = tpu.matmul %224, %225, %cst_85 {dimension_numbers = #tpu.dot_dimension_numbers<[1], [0], [0], [1], [0, 0, 1, 1], [], []>} : vector<8x8xf32>, vector<8x32xf32>, vector<8x32xf32> -> vector<8x32xf32>
    %227 = arith.addf %206, %226 : vector<8x32xf32>
    %228 = vector.broadcast %11 : vector<1x32xf32> to vector<8x32xf32>
    %229 = arith.addf %227, %228 : vector<8x32xf32>
    %230 = arith.addf %139, %229 : vector<8x32xf32>
    %231 = vector.extract_strided_slice %16 {offsets = [2, 0], sizes = [1, 32], strides = [1, 1]} : vector<6x32xf32> to vector<1x32xf32>
    %232 = vector.extract_strided_slice %16 {offsets = [3, 0], sizes = [1, 32], strides = [1, 1]} : vector<6x32xf32> to vector<1x32xf32>
    %cst_86 = arith.constant dense<0.000000e+00> : vector<8xf32>
    %233 = vector.multi_reduction <add>, %230, %cst_86 [1] : vector<8x32xf32> to vector<8xf32>
    %234 = vector.shape_cast %233 : vector<8xf32> to vector<8x1xf32>
    %cst_87 = arith.constant 3.200000e+01 : f32
    %235 = vector.broadcast %cst_87 : f32 to vector<8x1xf32>
    %236 = arith.divf %234, %235 : vector<8x1xf32>
    %237 = vector.broadcast %236 : vector<8x1xf32> to vector<8x32xf32>
    %238 = arith.subf %230, %237 : vector<8x32xf32>
    %239 = arith.mulf %238, %238 : vector<8x32xf32>
    %cst_88 = arith.constant dense<0.000000e+00> : vector<8xf32>
    %240 = vector.multi_reduction <add>, %239, %cst_88 [1] : vector<8x32xf32> to vector<8xf32>
    %241 = vector.shape_cast %240 : vector<8xf32> to vector<8x1xf32>
    %cst_89 = arith.constant 3.200000e+01 : f32
    %242 = vector.broadcast %cst_89 : f32 to vector<8x1xf32>
    %243 = arith.divf %241, %242 : vector<8x1xf32>
    %244 = vector.broadcast %236 : vector<8x1xf32> to vector<8x32xf32>
    %245 = arith.subf %230, %244 : vector<8x32xf32>
    %cst_90 = arith.constant 9.99999974E-6 : f32
    %246 = vector.broadcast %cst_90 : f32 to vector<8x1xf32>
    %247 = arith.addf %243, %246 : vector<8x1xf32>
    %248 = math.rsqrt %247 : vector<8x1xf32>
    %249 = vector.broadcast %248 : vector<8x1xf32> to vector<8x32xf32>
    %250 = arith.mulf %245, %249 : vector<8x32xf32>
    %251 = vector.broadcast %231 : vector<1x32xf32> to vector<8x32xf32>
    %252 = arith.mulf %250, %251 : vector<8x32xf32>
    %253 = vector.broadcast %232 : vector<1x32xf32> to vector<8x32xf32>
    %254 = arith.addf %252, %253 : vector<8x32xf32>
    %cst_91 = arith.constant dense<0.000000e+00> : vector<8x64xf32>
    %255 = tpu.matmul %254, %12, %cst_91 {dimension_numbers = #tpu.dot_dimension_numbers<[1], [0], [0], [1], [0, 0, 1, 1], [], []>} : vector<8x32xf32>, vector<32x64xf32>, vector<8x64xf32> -> vector<8x64xf32>
    %256 = vector.broadcast %13 : vector<1x64xf32> to vector<8x64xf32>
    %257 = arith.addf %255, %256 : vector<8x64xf32>
    %cst_92 = arith.constant 0.000000e+00 : f32
    %258 = vector.broadcast %cst_92 : f32 to vector<8x64xf32>
    %259 = arith.maximumf %257, %258 : vector<8x64xf32>
    %cst_93 = arith.constant dense<0.000000e+00> : vector<8x32xf32>
    %260 = tpu.matmul %259, %14, %cst_93 {dimension_numbers = #tpu.dot_dimension_numbers<[1], [0], [0], [1], [0, 0, 1, 1], [], []>} : vector<8x64xf32>, vector<64x32xf32>, vector<8x32xf32> -> vector<8x32xf32>
    %261 = vector.broadcast %15 : vector<1x32xf32> to vector<8x32xf32>
    %262 = arith.addf %260, %261 : vector<8x32xf32>
    %263 = arith.addf %254, %262 : vector<8x32xf32>
    %264 = vector.extract_strided_slice %16 {offsets = [4, 0], sizes = [1, 32], strides = [1, 1]} : vector<6x32xf32> to vector<1x32xf32>
    %265 = vector.extract_strided_slice %16 {offsets = [5, 0], sizes = [1, 32], strides = [1, 1]} : vector<6x32xf32> to vector<1x32xf32>
    %cst_94 = arith.constant dense<0.000000e+00> : vector<8xf32>
    %266 = vector.multi_reduction <add>, %263, %cst_94 [1] : vector<8x32xf32> to vector<8xf32>
    %267 = vector.shape_cast %266 : vector<8xf32> to vector<8x1xf32>
    %cst_95 = arith.constant 3.200000e+01 : f32
    %268 = vector.broadcast %cst_95 : f32 to vector<8x1xf32>
    %269 = arith.divf %267, %268 : vector<8x1xf32>
    %270 = vector.broadcast %269 : vector<8x1xf32> to vector<8x32xf32>
    %271 = arith.subf %263, %270 : vector<8x32xf32>
    %272 = arith.mulf %271, %271 : vector<8x32xf32>
    %cst_96 = arith.constant dense<0.000000e+00> : vector<8xf32>
    %273 = vector.multi_reduction <add>, %272, %cst_96 [1] : vector<8x32xf32> to vector<8xf32>
    %274 = vector.shape_cast %273 : vector<8xf32> to vector<8x1xf32>
    %cst_97 = arith.constant 3.200000e+01 : f32
    %275 = vector.broadcast %cst_97 : f32 to vector<8x1xf32>
    %276 = arith.divf %274, %275 : vector<8x1xf32>
    %277 = vector.broadcast %269 : vector<8x1xf32> to vector<8x32xf32>
    %278 = arith.subf %263, %277 : vector<8x32xf32>
    %cst_98 = arith.constant 9.99999974E-6 : f32
    %279 = vector.broadcast %cst_98 : f32 to vector<8x1xf32>
    %280 = arith.addf %276, %279 : vector<8x1xf32>
    %281 = math.rsqrt %280 : vector<8x1xf32>
    %282 = vector.broadcast %281 : vector<8x1xf32> to vector<8x32xf32>
    %283 = arith.mulf %278, %282 : vector<8x32xf32>
    %284 = vector.broadcast %264 : vector<1x32xf32> to vector<8x32xf32>
    %285 = arith.mulf %283, %284 : vector<8x32xf32>
    %286 = vector.broadcast %265 : vector<1x32xf32> to vector<8x32xf32>
    %287 = arith.addf %285, %286 : vector<8x32xf32>
    %cst_99 = arith.constant dense<0.000000e+00> : vector<8x96xf32>
    %288 = tpu.matmul %287, %4, %cst_99 {dimension_numbers = #tpu.dot_dimension_numbers<[1], [0], [0], [1], [0, 0, 1, 1], [], []>} : vector<8x32xf32>, vector<32x96xf32>, vector<8x96xf32> -> vector<8x96xf32>
    %289 = vector.broadcast %5 : vector<1x96xf32> to vector<8x96xf32>
    %290 = arith.addf %288, %289 : vector<8x96xf32>
    %291 = vector.extract_strided_slice %290 {offsets = [0, 0], sizes = [8, 32], strides = [1, 1]} : vector<8x96xf32> to vector<8x32xf32>
    %292 = vector.extract_strided_slice %290 {offsets = [0, 32], sizes = [8, 32], strides = [1, 1]} : vector<8x96xf32> to vector<8x32xf32>
    %293 = vector.extract_strided_slice %290 {offsets = [0, 64], sizes = [8, 32], strides = [1, 1]} : vector<8x96xf32> to vector<8x32xf32>
    %294 = vector.extract_strided_slice %291 {offsets = [0, 0], sizes = [8, 8], strides = [1, 1]} : vector<8x32xf32> to vector<8x8xf32>
    %295 = vector.extract_strided_slice %292 {offsets = [0, 0], sizes = [8, 8], strides = [1, 1]} : vector<8x32xf32> to vector<8x8xf32>
    %296 = vector.extract_strided_slice %293 {offsets = [0, 0], sizes = [8, 8], strides = [1, 1]} : vector<8x32xf32> to vector<8x8xf32>
    %cst_100 = arith.constant 0.353553385 : f32
    %297 = vector.broadcast %cst_100 : f32 to vector<8x8xf32>
    %298 = arith.mulf %294, %297 : vector<8x8xf32>
    %299 = tpu.transpose %295, [1, 0] : vector<8x8xf32> -> vector<8x8xf32>
    %cst_101 = arith.constant dense<0.000000e+00> : vector<8x8xf32>
    %300 = tpu.matmul %298, %299, %cst_101 {dimension_numbers = #tpu.dot_dimension_numbers<[1], [0], [0], [1], [0, 0, 1, 1], [], []>} : vector<8x8xf32>, vector<8x8xf32>, vector<8x8xf32> -> vector<8x8xf32>
    %cst_102 = arith.constant dense<0xFF800000> : vector<8xf32>
    %301 = vector.multi_reduction <maximumf>, %300, %cst_102 [1] : vector<8x8xf32> to vector<8xf32>
    %302 = vector.shape_cast %301 : vector<8xf32> to vector<8x1xf32>
    %303 = vector.broadcast %302 : vector<8x1xf32> to vector<8x8xf32>
    %304 = arith.subf %300, %303 : vector<8x8xf32>
    %305 = math.exp %304 : vector<8x8xf32>
    %cst_103 = arith.constant dense<0.000000e+00> : vector<8xf32>
    %306 = vector.multi_reduction <add>, %305, %cst_103 [1] : vector<8x8xf32> to vector<8xf32>
    %307 = vector.shape_cast %306 : vector<8xf32> to vector<8x1xf32>
    %308 = tpu.reciprocal %307 {approx = true} : vector<8x1xf32> -> vector<8x1xf32>
    %309 = vector.broadcast %308 : vector<8x1xf32> to vector<8x8xf32>
    %310 = arith.mulf %305, %309 : vector<8x8xf32>
    %cst_104 = arith.constant dense<0.000000e+00> : vector<8x8xf32>
    %311 = tpu.matmul %310, %296, %cst_104 {dimension_numbers = #tpu.dot_dimension_numbers<[1], [0], [0], [1], [0, 0, 1, 1], [], []>} : vector<8x8xf32>, vector<8x8xf32>, vector<8x8xf32> -> vector<8x8xf32>
    %312 = vector.extract_strided_slice %6 {offsets = [0, 0], sizes = [8, 32], strides = [1, 1]} : vector<32x32xf32> to vector<8x32xf32>
    %cst_105 = arith.constant dense<0.000000e+00> : vector<8x32xf32>
    %313 = tpu.matmul %311, %312, %cst_105 {dimension_numbers = #tpu.dot_dimension_numbers<[1], [0], [0], [1], [0, 0, 1, 1], [], []>} : vector<8x8xf32>, vector<8x32xf32>, vector<8x32xf32> -> vector<8x32xf32>
    %314 = vector.extract_strided_slice %291 {offsets = [0, 8], sizes = [8, 8], strides = [1, 1]} : vector<8x32xf32> to vector<8x8xf32>
    %315 = vector.extract_strided_slice %292 {offsets = [0, 8], sizes = [8, 8], strides = [1, 1]} : vector<8x32xf32> to vector<8x8xf32>
    %316 = vector.extract_strided_slice %293 {offsets = [0, 8], sizes = [8, 8], strides = [1, 1]} : vector<8x32xf32> to vector<8x8xf32>
    %cst_106 = arith.constant 0.353553385 : f32
    %317 = vector.broadcast %cst_106 : f32 to vector<8x8xf32>
    %318 = arith.mulf %314, %317 : vector<8x8xf32>
    %319 = tpu.transpose %315, [1, 0] : vector<8x8xf32> -> vector<8x8xf32>
    %cst_107 = arith.constant dense<0.000000e+00> : vector<8x8xf32>
    %320 = tpu.matmul %318, %319, %cst_107 {dimension_numbers = #tpu.dot_dimension_numbers<[1], [0], [0], [1], [0, 0, 1, 1], [], []>} : vector<8x8xf32>, vector<8x8xf32>, vector<8x8xf32> -> vector<8x8xf32>
    %cst_108 = arith.constant dense<0xFF800000> : vector<8xf32>
    %321 = vector.multi_reduction <maximumf>, %320, %cst_108 [1] : vector<8x8xf32> to vector<8xf32>
    %322 = vector.shape_cast %321 : vector<8xf32> to vector<8x1xf32>
    %323 = vector.broadcast %322 : vector<8x1xf32> to vector<8x8xf32>
    %324 = arith.subf %320, %323 : vector<8x8xf32>
    %325 = math.exp %324 : vector<8x8xf32>
    %cst_109 = arith.constant dense<0.000000e+00> : vector<8xf32>
    %326 = vector.multi_reduction <add>, %325, %cst_109 [1] : vector<8x8xf32> to vector<8xf32>
    %327 = vector.shape_cast %326 : vector<8xf32> to vector<8x1xf32>
    %328 = tpu.reciprocal %327 {approx = true} : vector<8x1xf32> -> vector<8x1xf32>
    %329 = vector.broadcast %328 : vector<8x1xf32> to vector<8x8xf32>
    %330 = arith.mulf %325, %329 : vector<8x8xf32>
    %cst_110 = arith.constant dense<0.000000e+00> : vector<8x8xf32>
    %331 = tpu.matmul %330, %316, %cst_110 {dimension_numbers = #tpu.dot_dimension_numbers<[1], [0], [0], [1], [0, 0, 1, 1], [], []>} : vector<8x8xf32>, vector<8x8xf32>, vector<8x8xf32> -> vector<8x8xf32>
    %332 = vector.extract_strided_slice %6 {offsets = [8, 0], sizes = [8, 32], strides = [1, 1]} : vector<32x32xf32> to vector<8x32xf32>
    %cst_111 = arith.constant dense<0.000000e+00> : vector<8x32xf32>
    %333 = tpu.matmul %331, %332, %cst_111 {dimension_numbers = #tpu.dot_dimension_numbers<[1], [0], [0], [1], [0, 0, 1, 1], [], []>} : vector<8x8xf32>, vector<8x32xf32>, vector<8x32xf32> -> vector<8x32xf32>
    %334 = arith.addf %313, %333 : vector<8x32xf32>
    %335 = vector.extract_strided_slice %291 {offsets = [0, 16], sizes = [8, 8], strides = [1, 1]} : vector<8x32xf32> to vector<8x8xf32>
    %336 = vector.extract_strided_slice %292 {offsets = [0, 16], sizes = [8, 8], strides = [1, 1]} : vector<8x32xf32> to vector<8x8xf32>
    %337 = vector.extract_strided_slice %293 {offsets = [0, 16], sizes = [8, 8], strides = [1, 1]} : vector<8x32xf32> to vector<8x8xf32>
    %cst_112 = arith.constant 0.353553385 : f32
    %338 = vector.broadcast %cst_112 : f32 to vector<8x8xf32>
    %339 = arith.mulf %335, %338 : vector<8x8xf32>
    %340 = tpu.transpose %336, [1, 0] : vector<8x8xf32> -> vector<8x8xf32>
    %cst_113 = arith.constant dense<0.000000e+00> : vector<8x8xf32>
    %341 = tpu.matmul %339, %340, %cst_113 {dimension_numbers = #tpu.dot_dimension_numbers<[1], [0], [0], [1], [0, 0, 1, 1], [], []>} : vector<8x8xf32>, vector<8x8xf32>, vector<8x8xf32> -> vector<8x8xf32>
    %cst_114 = arith.constant dense<0xFF800000> : vector<8xf32>
    %342 = vector.multi_reduction <maximumf>, %341, %cst_114 [1] : vector<8x8xf32> to vector<8xf32>
    %343 = vector.shape_cast %342 : vector<8xf32> to vector<8x1xf32>
    %344 = vector.broadcast %343 : vector<8x1xf32> to vector<8x8xf32>
    %345 = arith.subf %341, %344 : vector<8x8xf32>
    %346 = math.exp %345 : vector<8x8xf32>
    %cst_115 = arith.constant dense<0.000000e+00> : vector<8xf32>
    %347 = vector.multi_reduction <add>, %346, %cst_115 [1] : vector<8x8xf32> to vector<8xf32>
    %348 = vector.shape_cast %347 : vector<8xf32> to vector<8x1xf32>
    %349 = tpu.reciprocal %348 {approx = true} : vector<8x1xf32> -> vector<8x1xf32>
    %350 = vector.broadcast %349 : vector<8x1xf32> to vector<8x8xf32>
    %351 = arith.mulf %346, %350 : vector<8x8xf32>
    %cst_116 = arith.constant dense<0.000000e+00> : vector<8x8xf32>
    %352 = tpu.matmul %351, %337, %cst_116 {dimension_numbers = #tpu.dot_dimension_numbers<[1], [0], [0], [1], [0, 0, 1, 1], [], []>} : vector<8x8xf32>, vector<8x8xf32>, vector<8x8xf32> -> vector<8x8xf32>
    %353 = vector.extract_strided_slice %6 {offsets = [16, 0], sizes = [8, 32], strides = [1, 1]} : vector<32x32xf32> to vector<8x32xf32>
    %cst_117 = arith.constant dense<0.000000e+00> : vector<8x32xf32>
    %354 = tpu.matmul %352, %353, %cst_117 {dimension_numbers = #tpu.dot_dimension_numbers<[1], [0], [0], [1], [0, 0, 1, 1], [], []>} : vector<8x8xf32>, vector<8x32xf32>, vector<8x32xf32> -> vector<8x32xf32>
    %355 = arith.addf %334, %354 : vector<8x32xf32>
    %356 = vector.extract_strided_slice %291 {offsets = [0, 24], sizes = [8, 8], strides = [1, 1]} : vector<8x32xf32> to vector<8x8xf32>
    %357 = vector.extract_strided_slice %292 {offsets = [0, 24], sizes = [8, 8], strides = [1, 1]} : vector<8x32xf32> to vector<8x8xf32>
    %358 = vector.extract_strided_slice %293 {offsets = [0, 24], sizes = [8, 8], strides = [1, 1]} : vector<8x32xf32> to vector<8x8xf32>
    %cst_118 = arith.constant 0.353553385 : f32
    %359 = vector.broadcast %cst_118 : f32 to vector<8x8xf32>
    %360 = arith.mulf %356, %359 : vector<8x8xf32>
    %361 = tpu.transpose %357, [1, 0] : vector<8x8xf32> -> vector<8x8xf32>
    %cst_119 = arith.constant dense<0.000000e+00> : vector<8x8xf32>
    %362 = tpu.matmul %360, %361, %cst_119 {dimension_numbers = #tpu.dot_dimension_numbers<[1], [0], [0], [1], [0, 0, 1, 1], [], []>} : vector<8x8xf32>, vector<8x8xf32>, vector<8x8xf32> -> vector<8x8xf32>
    %cst_120 = arith.constant dense<0xFF800000> : vector<8xf32>
    %363 = vector.multi_reduction <maximumf>, %362, %cst_120 [1] : vector<8x8xf32> to vector<8xf32>
    %364 = vector.shape_cast %363 : vector<8xf32> to vector<8x1xf32>
    %365 = vector.broadcast %364 : vector<8x1xf32> to vector<8x8xf32>
    %366 = arith.subf %362, %365 : vector<8x8xf32>
    %367 = math.exp %366 : vector<8x8xf32>
    %cst_121 = arith.constant dense<0.000000e+00> : vector<8xf32>
    %368 = vector.multi_reduction <add>, %367, %cst_121 [1] : vector<8x8xf32> to vector<8xf32>
    %369 = vector.shape_cast %368 : vector<8xf32> to vector<8x1xf32>
    %370 = tpu.reciprocal %369 {approx = true} : vector<8x1xf32> -> vector<8x1xf32>
    %371 = vector.broadcast %370 : vector<8x1xf32> to vector<8x8xf32>
    %372 = arith.mulf %367, %371 : vector<8x8xf32>
    %cst_122 = arith.constant dense<0.000000e+00> : vector<8x8xf32>
    %373 = tpu.matmul %372, %358, %cst_122 {dimension_numbers = #tpu.dot_dimension_numbers<[1], [0], [0], [1], [0, 0, 1, 1], [], []>} : vector<8x8xf32>, vector<8x8xf32>, vector<8x8xf32> -> vector<8x8xf32>
    %374 = vector.extract_strided_slice %6 {offsets = [24, 0], sizes = [8, 32], strides = [1, 1]} : vector<32x32xf32> to vector<8x32xf32>
    %cst_123 = arith.constant dense<0.000000e+00> : vector<8x32xf32>
    %375 = tpu.matmul %373, %374, %cst_123 {dimension_numbers = #tpu.dot_dimension_numbers<[1], [0], [0], [1], [0, 0, 1, 1], [], []>} : vector<8x8xf32>, vector<8x32xf32>, vector<8x32xf32> -> vector<8x32xf32>
    %376 = arith.addf %355, %375 : vector<8x32xf32>
    %377 = vector.broadcast %7 : vector<1x32xf32> to vector<8x32xf32>
    %378 = arith.addf %376, %377 : vector<8x32xf32>
    %379 = arith.addf %287, %378 : vector<8x32xf32>
    %380 = vector.extract_strided_slice %16 {offsets = [0, 0], sizes = [1, 32], strides = [1, 1]} : vector<6x32xf32> to vector<1x32xf32>
    %381 = vector.extract_strided_slice %16 {offsets = [1, 0], sizes = [1, 32], strides = [1, 1]} : vector<6x32xf32> to vector<1x32xf32>
    %cst_124 = arith.constant dense<0.000000e+00> : vector<8xf32>
    %382 = vector.multi_reduction <add>, %379, %cst_124 [1] : vector<8x32xf32> to vector<8xf32>
    %383 = vector.shape_cast %382 : vector<8xf32> to vector<8x1xf32>
    %cst_125 = arith.constant 3.200000e+01 : f32
    %384 = vector.broadcast %cst_125 : f32 to vector<8x1xf32>
    %385 = arith.divf %383, %384 : vector<8x1xf32>
    %386 = vector.broadcast %385 : vector<8x1xf32> to vector<8x32xf32>
    %387 = arith.subf %379, %386 : vector<8x32xf32>
    %388 = arith.mulf %387, %387 : vector<8x32xf32>
    %cst_126 = arith.constant dense<0.000000e+00> : vector<8xf32>
    %389 = vector.multi_reduction <add>, %388, %cst_126 [1] : vector<8x32xf32> to vector<8xf32>
    %390 = vector.shape_cast %389 : vector<8xf32> to vector<8x1xf32>
    %cst_127 = arith.constant 3.200000e+01 : f32
    %391 = vector.broadcast %cst_127 : f32 to vector<8x1xf32>
    %392 = arith.divf %390, %391 : vector<8x1xf32>
    %393 = vector.broadcast %385 : vector<8x1xf32> to vector<8x32xf32>
    %394 = arith.subf %379, %393 : vector<8x32xf32>
    %cst_128 = arith.constant 9.99999974E-6 : f32
    %395 = vector.broadcast %cst_128 : f32 to vector<8x1xf32>
    %396 = arith.addf %392, %395 : vector<8x1xf32>
    %397 = math.rsqrt %396 : vector<8x1xf32>
    %398 = vector.broadcast %397 : vector<8x1xf32> to vector<8x32xf32>
    %399 = arith.mulf %394, %398 : vector<8x32xf32>
    %400 = vector.broadcast %380 : vector<1x32xf32> to vector<8x32xf32>
    %401 = arith.mulf %399, %400 : vector<8x32xf32>
    %402 = vector.broadcast %381 : vector<1x32xf32> to vector<8x32xf32>
    %403 = arith.addf %401, %402 : vector<8x32xf32>
    %404 = vector.extract_strided_slice %8 {offsets = [0, 0], sizes = [32, 32], strides = [1, 1]} : vector<32x96xf32> to vector<32x32xf32>
    %cst_129 = arith.constant dense<0.000000e+00> : vector<8x32xf32>
    %405 = tpu.matmul %403, %404, %cst_129 {dimension_numbers = #tpu.dot_dimension_numbers<[1], [0], [0], [1], [0, 0, 1, 1], [], []>} : vector<8x32xf32>, vector<32x32xf32>, vector<8x32xf32> -> vector<8x32xf32>
    %406 = vector.extract_strided_slice %9 {offsets = [0, 0], sizes = [1, 32], strides = [1, 1]} : vector<1x96xf32> to vector<1x32xf32>
    %407 = vector.broadcast %406 : vector<1x32xf32> to vector<8x32xf32>
    %408 = arith.addf %405, %407 : vector<8x32xf32>
    %409 = vector.extract_strided_slice %408 {offsets = [0, 0], sizes = [8, 8], strides = [1, 1]} : vector<8x32xf32> to vector<8x8xf32>
    %410 = vector.extract_strided_slice %22 {offsets = [0, 0], sizes = [16, 8], strides = [1, 1]} : vector<16x32xf32> to vector<16x8xf32>
    %411 = vector.extract_strided_slice %23 {offsets = [0, 0], sizes = [16, 8], strides = [1, 1]} : vector<16x32xf32> to vector<16x8xf32>
    %cst_130 = arith.constant 0.353553385 : f32
    %412 = vector.broadcast %cst_130 : f32 to vector<8x8xf32>
    %413 = arith.mulf %409, %412 : vector<8x8xf32>
    %414 = tpu.transpose %410, [1, 0] : vector<16x8xf32> -> vector<8x16xf32>
    %cst_131 = arith.constant dense<0.000000e+00> : vector<8x16xf32>
    %415 = tpu.matmul %413, %414, %cst_131 {dimension_numbers = #tpu.dot_dimension_numbers<[1], [0], [0], [1], [0, 0, 1, 1], [], []>} : vector<8x8xf32>, vector<8x16xf32>, vector<8x16xf32> -> vector<8x16xf32>
    %cst_132 = arith.constant dense<0xFF800000> : vector<8xf32>
    %416 = vector.multi_reduction <maximumf>, %415, %cst_132 [1] : vector<8x16xf32> to vector<8xf32>
    %417 = vector.shape_cast %416 : vector<8xf32> to vector<8x1xf32>
    %418 = vector.broadcast %417 : vector<8x1xf32> to vector<8x16xf32>
    %419 = arith.subf %415, %418 : vector<8x16xf32>
    %420 = math.exp %419 : vector<8x16xf32>
    %cst_133 = arith.constant dense<0.000000e+00> : vector<8xf32>
    %421 = vector.multi_reduction <add>, %420, %cst_133 [1] : vector<8x16xf32> to vector<8xf32>
    %422 = vector.shape_cast %421 : vector<8xf32> to vector<8x1xf32>
    %423 = tpu.reciprocal %422 {approx = true} : vector<8x1xf32> -> vector<8x1xf32>
    %424 = vector.broadcast %423 : vector<8x1xf32> to vector<8x16xf32>
    %425 = arith.mulf %420, %424 : vector<8x16xf32>
    %cst_134 = arith.constant dense<0.000000e+00> : vector<8x8xf32>
    %426 = tpu.matmul %425, %411, %cst_134 {dimension_numbers = #tpu.dot_dimension_numbers<[1], [0], [0], [1], [0, 0, 1, 1], [], []>} : vector<8x16xf32>, vector<16x8xf32>, vector<8x8xf32> -> vector<8x8xf32>
    %427 = vector.extract_strided_slice %10 {offsets = [0, 0], sizes = [8, 32], strides = [1, 1]} : vector<32x32xf32> to vector<8x32xf32>
    %cst_135 = arith.constant dense<0.000000e+00> : vector<8x32xf32>
    %428 = tpu.matmul %426, %427, %cst_135 {dimension_numbers = #tpu.dot_dimension_numbers<[1], [0], [0], [1], [0, 0, 1, 1], [], []>} : vector<8x8xf32>, vector<8x32xf32>, vector<8x32xf32> -> vector<8x32xf32>
    %429 = vector.extract_strided_slice %408 {offsets = [0, 8], sizes = [8, 8], strides = [1, 1]} : vector<8x32xf32> to vector<8x8xf32>
    %430 = vector.extract_strided_slice %22 {offsets = [0, 8], sizes = [16, 8], strides = [1, 1]} : vector<16x32xf32> to vector<16x8xf32>
    %431 = vector.extract_strided_slice %23 {offsets = [0, 8], sizes = [16, 8], strides = [1, 1]} : vector<16x32xf32> to vector<16x8xf32>
    %cst_136 = arith.constant 0.353553385 : f32
    %432 = vector.broadcast %cst_136 : f32 to vector<8x8xf32>
    %433 = arith.mulf %429, %432 : vector<8x8xf32>
    %434 = tpu.transpose %430, [1, 0] : vector<16x8xf32> -> vector<8x16xf32>
    %cst_137 = arith.constant dense<0.000000e+00> : vector<8x16xf32>
    %435 = tpu.matmul %433, %434, %cst_137 {dimension_numbers = #tpu.dot_dimension_numbers<[1], [0], [0], [1], [0, 0, 1, 1], [], []>} : vector<8x8xf32>, vector<8x16xf32>, vector<8x16xf32> -> vector<8x16xf32>
    %cst_138 = arith.constant dense<0xFF800000> : vector<8xf32>
    %436 = vector.multi_reduction <maximumf>, %435, %cst_138 [1] : vector<8x16xf32> to vector<8xf32>
    %437 = vector.shape_cast %436 : vector<8xf32> to vector<8x1xf32>
    %438 = vector.broadcast %437 : vector<8x1xf32> to vector<8x16xf32>
    %439 = arith.subf %435, %438 : vector<8x16xf32>
    %440 = math.exp %439 : vector<8x16xf32>
    %cst_139 = arith.constant dense<0.000000e+00> : vector<8xf32>
    %441 = vector.multi_reduction <add>, %440, %cst_139 [1] : vector<8x16xf32> to vector<8xf32>
    %442 = vector.shape_cast %441 : vector<8xf32> to vector<8x1xf32>
    %443 = tpu.reciprocal %442 {approx = true} : vector<8x1xf32> -> vector<8x1xf32>
    %444 = vector.broadcast %443 : vector<8x1xf32> to vector<8x16xf32>
    %445 = arith.mulf %440, %444 : vector<8x16xf32>
    %cst_140 = arith.constant dense<0.000000e+00> : vector<8x8xf32>
    %446 = tpu.matmul %445, %431, %cst_140 {dimension_numbers = #tpu.dot_dimension_numbers<[1], [0], [0], [1], [0, 0, 1, 1], [], []>} : vector<8x16xf32>, vector<16x8xf32>, vector<8x8xf32> -> vector<8x8xf32>
    %447 = vector.extract_strided_slice %10 {offsets = [8, 0], sizes = [8, 32], strides = [1, 1]} : vector<32x32xf32> to vector<8x32xf32>
    %cst_141 = arith.constant dense<0.000000e+00> : vector<8x32xf32>
    %448 = tpu.matmul %446, %447, %cst_141 {dimension_numbers = #tpu.dot_dimension_numbers<[1], [0], [0], [1], [0, 0, 1, 1], [], []>} : vector<8x8xf32>, vector<8x32xf32>, vector<8x32xf32> -> vector<8x32xf32>
    %449 = arith.addf %428, %448 : vector<8x32xf32>
    %450 = vector.extract_strided_slice %408 {offsets = [0, 16], sizes = [8, 8], strides = [1, 1]} : vector<8x32xf32> to vector<8x8xf32>
    %451 = vector.extract_strided_slice %22 {offsets = [0, 16], sizes = [16, 8], strides = [1, 1]} : vector<16x32xf32> to vector<16x8xf32>
    %452 = vector.extract_strided_slice %23 {offsets = [0, 16], sizes = [16, 8], strides = [1, 1]} : vector<16x32xf32> to vector<16x8xf32>
    %cst_142 = arith.constant 0.353553385 : f32
    %453 = vector.broadcast %cst_142 : f32 to vector<8x8xf32>
    %454 = arith.mulf %450, %453 : vector<8x8xf32>
    %455 = tpu.transpose %451, [1, 0] : vector<16x8xf32> -> vector<8x16xf32>
    %cst_143 = arith.constant dense<0.000000e+00> : vector<8x16xf32>
    %456 = tpu.matmul %454, %455, %cst_143 {dimension_numbers = #tpu.dot_dimension_numbers<[1], [0], [0], [1], [0, 0, 1, 1], [], []>} : vector<8x8xf32>, vector<8x16xf32>, vector<8x16xf32> -> vector<8x16xf32>
    %cst_144 = arith.constant dense<0xFF800000> : vector<8xf32>
    %457 = vector.multi_reduction <maximumf>, %456, %cst_144 [1] : vector<8x16xf32> to vector<8xf32>
    %458 = vector.shape_cast %457 : vector<8xf32> to vector<8x1xf32>
    %459 = vector.broadcast %458 : vector<8x1xf32> to vector<8x16xf32>
    %460 = arith.subf %456, %459 : vector<8x16xf32>
    %461 = math.exp %460 : vector<8x16xf32>
    %cst_145 = arith.constant dense<0.000000e+00> : vector<8xf32>
    %462 = vector.multi_reduction <add>, %461, %cst_145 [1] : vector<8x16xf32> to vector<8xf32>
    %463 = vector.shape_cast %462 : vector<8xf32> to vector<8x1xf32>
    %464 = tpu.reciprocal %463 {approx = true} : vector<8x1xf32> -> vector<8x1xf32>
    %465 = vector.broadcast %464 : vector<8x1xf32> to vector<8x16xf32>
    %466 = arith.mulf %461, %465 : vector<8x16xf32>
    %cst_146 = arith.constant dense<0.000000e+00> : vector<8x8xf32>
    %467 = tpu.matmul %466, %452, %cst_146 {dimension_numbers = #tpu.dot_dimension_numbers<[1], [0], [0], [1], [0, 0, 1, 1], [], []>} : vector<8x16xf32>, vector<16x8xf32>, vector<8x8xf32> -> vector<8x8xf32>
    %468 = vector.extract_strided_slice %10 {offsets = [16, 0], sizes = [8, 32], strides = [1, 1]} : vector<32x32xf32> to vector<8x32xf32>
    %cst_147 = arith.constant dense<0.000000e+00> : vector<8x32xf32>
    %469 = tpu.matmul %467, %468, %cst_147 {dimension_numbers = #tpu.dot_dimension_numbers<[1], [0], [0], [1], [0, 0, 1, 1], [], []>} : vector<8x8xf32>, vector<8x32xf32>, vector<8x32xf32> -> vector<8x32xf32>
    %470 = arith.addf %449, %469 : vector<8x32xf32>
    %471 = vector.extract_strided_slice %408 {offsets = [0, 24], sizes = [8, 8], strides = [1, 1]} : vector<8x32xf32> to vector<8x8xf32>
    %472 = vector.extract_strided_slice %22 {offsets = [0, 24], sizes = [16, 8], strides = [1, 1]} : vector<16x32xf32> to vector<16x8xf32>
    %473 = vector.extract_strided_slice %23 {offsets = [0, 24], sizes = [16, 8], strides = [1, 1]} : vector<16x32xf32> to vector<16x8xf32>
    %cst_148 = arith.constant 0.353553385 : f32
    %474 = vector.broadcast %cst_148 : f32 to vector<8x8xf32>
    %475 = arith.mulf %471, %474 : vector<8x8xf32>
    %476 = tpu.transpose %472, [1, 0] : vector<16x8xf32> -> vector<8x16xf32>
    %cst_149 = arith.constant dense<0.000000e+00> : vector<8x16xf32>
    %477 = tpu.matmul %475, %476, %cst_149 {dimension_numbers = #tpu.dot_dimension_numbers<[1], [0], [0], [1], [0, 0, 1, 1], [], []>} : vector<8x8xf32>, vector<8x16xf32>, vector<8x16xf32> -> vector<8x16xf32>
    %cst_150 = arith.constant dense<0xFF800000> : vector<8xf32>
    %478 = vector.multi_reduction <maximumf>, %477, %cst_150 [1] : vector<8x16xf32> to vector<8xf32>
    %479 = vector.shape_cast %478 : vector<8xf32> to vector<8x1xf32>
    %480 = vector.broadcast %479 : vector<8x1xf32> to vector<8x16xf32>
    %481 = arith.subf %477, %480 : vector<8x16xf32>
    %482 = math.exp %481 : vector<8x16xf32>
    %cst_151 = arith.constant dense<0.000000e+00> : vector<8xf32>
    %483 = vector.multi_reduction <add>, %482, %cst_151 [1] : vector<8x16xf32> to vector<8xf32>
    %484 = vector.shape_cast %483 : vector<8xf32> to vector<8x1xf32>
    %485 = tpu.reciprocal %484 {approx = true} : vector<8x1xf32> -> vector<8x1xf32>
    %486 = vector.broadcast %485 : vector<8x1xf32> to vector<8x16xf32>
    %487 = arith.mulf %482, %486 : vector<8x16xf32>
    %cst_152 = arith.constant dense<0.000000e+00> : vector<8x8xf32>
    %488 = tpu.matmul %487, %473, %cst_152 {dimension_numbers = #tpu.dot_dimension_numbers<[1], [0], [0], [1], [0, 0, 1, 1], [], []>} : vector<8x16xf32>, vector<16x8xf32>, vector<8x8xf32> -> vector<8x8xf32>
    %489 = vector.extract_strided_slice %10 {offsets = [24, 0], sizes = [8, 32], strides = [1, 1]} : vector<32x32xf32> to vector<8x32xf32>
    %cst_153 = arith.constant dense<0.000000e+00> : vector<8x32xf32>
    %490 = tpu.matmul %488, %489, %cst_153 {dimension_numbers = #tpu.dot_dimension_numbers<[1], [0], [0], [1], [0, 0, 1, 1], [], []>} : vector<8x8xf32>, vector<8x32xf32>, vector<8x32xf32> -> vector<8x32xf32>
    %491 = arith.addf %470, %490 : vector<8x32xf32>
    %492 = vector.broadcast %11 : vector<1x32xf32> to vector<8x32xf32>
    %493 = arith.addf %491, %492 : vector<8x32xf32>
    %494 = arith.addf %403, %493 : vector<8x32xf32>
    %495 = vector.extract_strided_slice %16 {offsets = [2, 0], sizes = [1, 32], strides = [1, 1]} : vector<6x32xf32> to vector<1x32xf32>
    %496 = vector.extract_strided_slice %16 {offsets = [3, 0], sizes = [1, 32], strides = [1, 1]} : vector<6x32xf32> to vector<1x32xf32>
    %cst_154 = arith.constant dense<0.000000e+00> : vector<8xf32>
    %497 = vector.multi_reduction <add>, %494, %cst_154 [1] : vector<8x32xf32> to vector<8xf32>
    %498 = vector.shape_cast %497 : vector<8xf32> to vector<8x1xf32>
    %cst_155 = arith.constant 3.200000e+01 : f32
    %499 = vector.broadcast %cst_155 : f32 to vector<8x1xf32>
    %500 = arith.divf %498, %499 : vector<8x1xf32>
    %501 = vector.broadcast %500 : vector<8x1xf32> to vector<8x32xf32>
    %502 = arith.subf %494, %501 : vector<8x32xf32>
    %503 = arith.mulf %502, %502 : vector<8x32xf32>
    %cst_156 = arith.constant dense<0.000000e+00> : vector<8xf32>
    %504 = vector.multi_reduction <add>, %503, %cst_156 [1] : vector<8x32xf32> to vector<8xf32>
    %505 = vector.shape_cast %504 : vector<8xf32> to vector<8x1xf32>
    %cst_157 = arith.constant 3.200000e+01 : f32
    %506 = vector.broadcast %cst_157 : f32 to vector<8x1xf32>
    %507 = arith.divf %505, %506 : vector<8x1xf32>
    %508 = vector.broadcast %500 : vector<8x1xf32> to vector<8x32xf32>
    %509 = arith.subf %494, %508 : vector<8x32xf32>
    %cst_158 = arith.constant 9.99999974E-6 : f32
    %510 = vector.broadcast %cst_158 : f32 to vector<8x1xf32>
    %511 = arith.addf %507, %510 : vector<8x1xf32>
    %512 = math.rsqrt %511 : vector<8x1xf32>
    %513 = vector.broadcast %512 : vector<8x1xf32> to vector<8x32xf32>
    %514 = arith.mulf %509, %513 : vector<8x32xf32>
    %515 = vector.broadcast %495 : vector<1x32xf32> to vector<8x32xf32>
    %516 = arith.mulf %514, %515 : vector<8x32xf32>
    %517 = vector.broadcast %496 : vector<1x32xf32> to vector<8x32xf32>
    %518 = arith.addf %516, %517 : vector<8x32xf32>
    %cst_159 = arith.constant dense<0.000000e+00> : vector<8x64xf32>
    %519 = tpu.matmul %518, %12, %cst_159 {dimension_numbers = #tpu.dot_dimension_numbers<[1], [0], [0], [1], [0, 0, 1, 1], [], []>} : vector<8x32xf32>, vector<32x64xf32>, vector<8x64xf32> -> vector<8x64xf32>
    %520 = vector.broadcast %13 : vector<1x64xf32> to vector<8x64xf32>
    %521 = arith.addf %519, %520 : vector<8x64xf32>
    %cst_160 = arith.constant 0.000000e+00 : f32
    %522 = vector.broadcast %cst_160 : f32 to vector<8x64xf32>
    %523 = arith.maximumf %521, %522 : vector<8x64xf32>
    %cst_161 = arith.constant dense<0.000000e+00> : vector<8x32xf32>
    %524 = tpu.matmul %523, %14, %cst_161 {dimension_numbers = #tpu.dot_dimension_numbers<[1], [0], [0], [1], [0, 0, 1, 1], [], []>} : vector<8x64xf32>, vector<64x32xf32>, vector<8x32xf32> -> vector<8x32xf32>
    %525 = vector.broadcast %15 : vector<1x32xf32> to vector<8x32xf32>
    %526 = arith.addf %524, %525 : vector<8x32xf32>
    %527 = arith.addf %518, %526 : vector<8x32xf32>
    %528 = vector.extract_strided_slice %16 {offsets = [4, 0], sizes = [1, 32], strides = [1, 1]} : vector<6x32xf32> to vector<1x32xf32>
    %529 = vector.extract_strided_slice %16 {offsets = [5, 0], sizes = [1, 32], strides = [1, 1]} : vector<6x32xf32> to vector<1x32xf32>
    %cst_162 = arith.constant dense<0.000000e+00> : vector<8xf32>
    %530 = vector.multi_reduction <add>, %527, %cst_162 [1] : vector<8x32xf32> to vector<8xf32>
    %531 = vector.shape_cast %530 : vector<8xf32> to vector<8x1xf32>
    %cst_163 = arith.constant 3.200000e+01 : f32
    %532 = vector.broadcast %cst_163 : f32 to vector<8x1xf32>
    %533 = arith.divf %531, %532 : vector<8x1xf32>
    %534 = vector.broadcast %533 : vector<8x1xf32> to vector<8x32xf32>
    %535 = arith.subf %527, %534 : vector<8x32xf32>
    %536 = arith.mulf %535, %535 : vector<8x32xf32>
    %cst_164 = arith.constant dense<0.000000e+00> : vector<8xf32>
    %537 = vector.multi_reduction <add>, %536, %cst_164 [1] : vector<8x32xf32> to vector<8xf32>
    %538 = vector.shape_cast %537 : vector<8xf32> to vector<8x1xf32>
    %cst_165 = arith.constant 3.200000e+01 : f32
    %539 = vector.broadcast %cst_165 : f32 to vector<8x1xf32>
    %540 = arith.divf %538, %539 : vector<8x1xf32>
    %541 = vector.broadcast %533 : vector<8x1xf32> to vector<8x32xf32>
    %542 = arith.subf %527, %541 : vector<8x32xf32>
    %cst_166 = arith.constant 9.99999974E-6 : f32
    %543 = vector.broadcast %cst_166 : f32 to vector<8x1xf32>
    %544 = arith.addf %540, %543 : vector<8x1xf32>
    %545 = math.rsqrt %544 : vector<8x1xf32>
    %546 = vector.broadcast %545 : vector<8x1xf32> to vector<8x32xf32>
    %547 = arith.mulf %542, %546 : vector<8x32xf32>
    %548 = vector.broadcast %528 : vector<1x32xf32> to vector<8x32xf32>
    %549 = arith.mulf %547, %548 : vector<8x32xf32>
    %550 = vector.broadcast %529 : vector<1x32xf32> to vector<8x32xf32>
    %551 = arith.addf %549, %550 : vector<8x32xf32>
    %c0_167 = arith.constant 0 : index
    %c0_168 = arith.constant 0 : index
    %c0_169 = arith.constant 0 : index
    %552 = vector.load %arg16[%c0_167, %c0_168, %c0_169] : memref<1x8x32xf32, #tpu.memory_space<vmem>>, vector<1x8x32xf32>
    %553 = vector.shape_cast %552 : vector<1x8x32xf32> to vector<8x32xf32>
    %554 = vector.shape_cast %551 : vector<8x32xf32> to vector<1x8x32xf32>
    tpu.vector_store %arg16[%c0_167, %c0_168, %c0_169], %554 {strides = array<i32>} : memref<1x8x32xf32, #tpu.memory_space<vmem>>, vector<1x8x32xf32>,
    return
  }
  func.func @transform_0(%arg0: i32) -> (i32, i32, i32) {
    %c0_i32 = arith.constant 0 : i32
    %c0_i32_0 = arith.constant 0 : i32
    %c0_i32_1 = arith.constant 0 : i32
    return %arg0, %c0_i32, %c0_i32_0 : i32, i32, i32
  }
  func.func @transform_1(%arg0: i32) -> (i32, i32, i32) {
    %c0_i32 = arith.constant 0 : i32
    %c0_i32_0 = arith.constant 0 : i32
    %c0_i32_1 = arith.constant 0 : i32
    return %arg0, %c0_i32, %c0_i32_0 : i32, i32, i32
  }
  func.func @transform_2(%arg0: i32) -> (i32, i32) {
    %c0_i32 = arith.constant 0 : i32
    %c0_i32_0 = arith.constant 0 : i32
    %c0_i32_1 = arith.constant 0 : i32
    return %c0_i32, %c0_i32_0 : i32, i32
  }
  func.func @transform_3(%arg0: i32) -> (i32, i32) {
    %c0_i32 = arith.constant 0 : i32
    %c0_i32_0 = arith.constant 0 : i32
    %c0_i32_1 = arith.constant 0 : i32
    return %c0_i32, %c0_i32_0 : i32, i32
  }
  func.func @transform_4(%arg0: i32) -> (i32, i32) {
    %c0_i32 = arith.constant 0 : i32
    %c0_i32_0 = arith.constant 0 : i32
    %c0_i32_1 = arith.constant 0 : i32
    return %c0_i32, %c0_i32_0 : i32, i32
  }
  func.func @transform_5(%arg0: i32) -> (i32, i32) {
    %c0_i32 = arith.constant 0 : i32
    %c0_i32_0 = arith.constant 0 : i32
    %c0_i32_1 = arith.constant 0 : i32
    return %c0_i32, %c0_i32_0 : i32, i32
  }
  func.func @transform_6(%arg0: i32) -> (i32, i32) {
    %c0_i32 = arith.constant 0 : i32
    %c0_i32_0 = arith.constant 0 : i32
    %c0_i32_1 = arith.constant 0 : i32
    return %c0_i32, %c0_i32_0 : i32, i32
  }
  func.func @transform_7(%arg0: i32) -> (i32, i32) {
    %c0_i32 = arith.constant 0 : i32
    %c0_i32_0 = arith.constant 0 : i32
    %c0_i32_1 = arith.constant 0 : i32
    return %c0_i32, %c0_i32_0 : i32, i32
  }
  func.func @transform_8(%arg0: i32) -> (i32, i32) {
    %c0_i32 = arith.constant 0 : i32
    %c0_i32_0 = arith.constant 0 : i32
    %c0_i32_1 = arith.constant 0 : i32
    return %c0_i32, %c0_i32_0 : i32, i32
  }
  func.func @transform_9(%arg0: i32) -> (i32, i32) {
    %c0_i32 = arith.constant 0 : i32
    %c0_i32_0 = arith.constant 0 : i32
    %c0_i32_1 = arith.constant 0 : i32
    return %c0_i32, %c0_i32_0 : i32, i32
  }
  func.func @transform_10(%arg0: i32) -> (i32, i32) {
    %c0_i32 = arith.constant 0 : i32
    %c0_i32_0 = arith.constant 0 : i32
    %c0_i32_1 = arith.constant 0 : i32
    return %c0_i32, %c0_i32_0 : i32, i32
  }
  func.func @transform_11(%arg0: i32) -> (i32, i32) {
    %c0_i32 = arith.constant 0 : i32
    %c0_i32_0 = arith.constant 0 : i32
    %c0_i32_1 = arith.constant 0 : i32
    return %c0_i32, %c0_i32_0 : i32, i32
  }
  func.func @transform_12(%arg0: i32) -> (i32, i32) {
    %c0_i32 = arith.constant 0 : i32
    %c0_i32_0 = arith.constant 0 : i32
    %c0_i32_1 = arith.constant 0 : i32
    return %c0_i32, %c0_i32_0 : i32, i32
  }
  func.func @transform_13(%arg0: i32) -> (i32, i32) {
    %c0_i32 = arith.constant 0 : i32
    %c0_i32_0 = arith.constant 0 : i32
    %c0_i32_1 = arith.constant 0 : i32
    return %c0_i32, %c0_i32_0 : i32, i32
  }
  func.func @transform_14(%arg0: i32) -> (i32, i32) {
    %c0_i32 = arith.constant 0 : i32
    %c0_i32_0 = arith.constant 0 : i32
    %c0_i32_1 = arith.constant 0 : i32
    return %c0_i32, %c0_i32_0 : i32, i32
  }
  func.func @transform_15(%arg0: i32) -> (i32, i32, i32) {
    %c0_i32 = arith.constant 0 : i32
    %c0_i32_0 = arith.constant 0 : i32
    %c0_i32_1 = arith.constant 0 : i32
    return %arg0, %c0_i32, %c0_i32_0 : i32, i32, i32
  }
}

</mosaic_0001>

<bundles_post_ra>
// kernel: transformer_decoder.1
= control target key start
LH: loop header
LB: loop body
LE: loop exit
PB: predicated region body
PF: predicated region fallthrough
CT: control target
= control target key end

     0   :  { %20 = vsyncpa [#allocation3], 0  ;;  %s7231_s0 = inlined_call_operand.vmem [shape: f32[2,8,32], index: 0, kind: input, shape index: {}]   ;;  %s7232_s1 = inlined_call_operand.vmem [shape: f32[2,16,32], index: 1, kind: input, shape index: {}]   ;;  %s7233_s2 = inlined_call_operand.vmem [shape: f32[32,96], index: 2, kind: input, shape index: {}]   ;;  %s7234_s3 = inlined_call_operand.vmem [shape: f32[1,96], index: 3, kind: input, shape index: {}]   ;;  %s7235_s4 = inlined_call_operand.vmem [shape: f32[32,32], index: 4, kind: input, shape index: {}]   ;;  %s7236_s5 = inlined_call_operand.vmem [shape: f32[1,32], index: 5, kind: input, shape index: {}]   ;;  %s7237_s6 = inlined_call_operand.vmem [shape: f32[32,96], index: 6, kind: input, shape index: {}]   ;;  %s7238_s7 = inlined_call_operand.vmem [shape: f32[1,96], index: 7, kind: input, shape index: {}]   ;;  %s7239_s8 = inlined_call_operand.vmem [shape: f32[32,32], index: 8, kind: input, shape index: {}]   ;;  %s7240_s9 = inlined_call_operand.vmem [shape: f32[1,32], index: 9, kind: input, shape index: {}]   ;;  %s7241_s10 = inlined_call_operand.vmem [shape: f32[32,64], index: 10, kind: input, shape index: {}]   ;;  %s7242_s11 = inlined_call_operand.hbm [shape: f32[1,64], index: 11, kind: input, shape index: {}]   ;;  %s7243_s12 = inlined_call_operand.vmem [shape: f32[64,32], index: 12, kind: input, shape index: {}]   ;;  %s7244_s13 = inlined_call_operand.hbm [shape: f32[1,32], index: 13, kind: input, shape index: {}]   ;;  %s7245_s14 = inlined_call_operand.vmem [shape: f32[6,32], index: 14, kind: input, shape index: {}]   ;;  %s7246_s15 = inlined_call_operand.vmem [shape: f32[2,8,32], index: 15, kind: output, shape index: {}]  }
   0x1   :  { %21 = vsyncpa [#allocation5], 0  ;;  %s6442_s18 = smov 0  }
   0x2 LB: > { %s6448_s19 = sadd.s32 4294967295, %s6344_s18   ;;  %p5331_p0 = scmp.ge.s32.totalorder %s6344_s18, 1  ;;  %s6344_s18 = sphi %s6442_s18, %s27_s18  }
   0x3   : > { %p383_p1 = scmp.lt.s32.totalorder %s6344_s18, 3  ;;  %p7247_p2 = scmp.eq.s32.totalorder %s6448_s19, 0 }
   0x4   : > { %s6346_s21 = smov [#allocation2]   ;;  %s6347_s23 = smov [#allocation4]  }
   0x5   : > { %p6453_p3 = pnand %p5331_p0, %p383_p1  ;;  %s423_s22 = sshll.u32 %s6346_s21, 4  ;;  %s424_s22 = int_to_ptr.vmem [resolvable:$true] %s423_s22 }
   0x6   : > { %s437_s24 = sshll.u32 %s6347_s23, 4  ;;  %s6274_s28 = scalar_lea.hbm %s7242_s11, 16  ;;  %s6465_s24 = int_to_ptr.vmem [resolvable:$true] %s437_s24 }
   0x7   : > { %s7258_s20 = scalar_select %p6453_p3, 1, 0 }
   0x8   : > { %p6118_p4 = pneg %p6453_p3  ;;  %p6275_p6 = scmp.ne.s32.totalorder %s7242_s11, %s6274_s28 }
   0x9   : > { %p6281_p10 = scmp.lt.u32.totalorder %s6274_s28, %s7242_s11 }
   0xa   : > { %p6461_p5 = pnand %p7247_p2, %p6118_p4 }
   0xc   : > { %p6276_p7 = pneg %p6461_p5 }
   0xe   : > { %p6277_p8 = pnand %p6276_p7, %p6275_p6 }
  0x10   : > { %p6278_p9 = pneg %p6277_p8 }
  0x12   : > { %p6283_p11 = pnand %p6281_p10, %p6278_p9 }
  0x14   : > { %6286 = shalt.err (!%p6283_p11)
}
  0x15   : > { %s6287_s21 = scalar_lea.vmem %s424_s22, 16  ;;  %s6294_s23 = scalar_lea.vmem %s424_s22, 32 }
  0x16   : > { %p6288_p12 = scmp.ne.s32.totalorder %s424_s22, %s6287_s21  ;;  %p6295_p1 = scmp.lt.s32.totalorder %s424_s22, %s424_s22 }
  0x17   : > { %p6296_p4 = scmp.lt.s32.totalorder %s6294_s23, %s6287_s21 }
  0x18   : > { %p6290_p13 = pnand %p6288_p12, %p6276_p7 }
  0x19   : > { %p6297_p2 = por %p6296_p4, %p6295_p1 }
  0x1a   : > { %p6291_p0 = pneg %p6290_p13 }
  0x1c   : > { %p6298_p3 = pnand %p6297_p2, %p6291_p0 }
  0x1e   : > { %6301 = shalt.err (!%p6298_p3)
}
  0x1f   : > { %6121 = dma.hbm_to_vmem [thread:$0]  (!%p6461_p5), %s7242_s11, 16, %s424_s22, [#allocation3]  }
  0x20   : > { %s6302_s30 = scalar_lea.hbm %s7244_s13, 16 }
  0x21   : > { %p6303_p6 = scmp.ne.s32.totalorder %s7244_s13, %s6302_s30  ;;  %p6309_p3 = scmp.lt.u32.totalorder %s6302_s30, %s7244_s13 }
  0x23   : > { %p6305_p8 = pnand %p6303_p6, %p6276_p7 }
  0x25   : > { %p6306_p2 = pneg %p6305_p8 }
  0x27   : > { %p6311_p9 = pnand %p6309_p3, %p6306_p2 }
  0x29   : > { %6314 = shalt.err (!%p6311_p9)
}
  0x2a   : > { %s6315_s22 = scalar_lea.vmem %s6465_s24, 16  ;;  %s6322_s26 = scalar_lea.vmem %s6465_s24, 32 }
  0x2b   : > { %p6316_p10 = scmp.ne.s32.totalorder %s6465_s24, %s6315_s22  ;;  %p6323_p13 = scmp.lt.s32.totalorder %s6465_s24, %s6465_s24 }
  0x2c   : > { %p6324_p0 = scmp.lt.s32.totalorder %s6322_s26, %s6315_s22 }
  0x2d   : > { %p6318_p11 = pnand %p6316_p10, %p6276_p7 }
  0x2e   : > { %p6325_p1 = por %p6324_p0, %p6323_p13 }
  0x2f   : > { %p6319_p12 = pneg %p6318_p11 }
  0x31   : > { %p6326_p4 = pnand %p6325_p1, %p6319_p12 }
  0x33   : > { %6329 = shalt.err (!%p6326_p4)
}
  0x34   : > { %6124 = dma.hbm_to_vmem [thread:$0]  (!%p6461_p5), %s7244_s13, 16, %s6465_s24, [#allocation5]  }
  0x35   : > { %p7260_p6 = scmp.ne.s32.totalorder %s7258_s20, 0 }
  0x36   : > { %p7261_p7 = scmp.eq.s32.totalorder (!%p7260_p6), %s6448_s19, 0 }
  0x37   : > { %468 = sbr.rel (%p7260_p6) target bundleno = 12971 (0x32ab), region = 80 }
  0x3e   : > { %6335 = dma.done.wait (%p7261_p7), [#allocation3], 16   ;;  %p7262_p8 = pmov %p7261_p7 }
  0x3f   : > { %p7263_p2 = pmov %p7261_p7 }
  0x40   : > { %6337 = vsyncadd (%p7262_p8), [#allocation3], 4294967280 }
  0x41   : > { %6339 = dma.done.wait (%p7263_p2), [#allocation5], 16   ;;  %p7264_p3 = pmov %p7263_p2 }
  0x42   : > { %p523_p9 = scmp.lt.s32.totalorder %s6448_s19, 1  ;;  %v6348_v0 = vmov 0.0|0.0   ;;  %vm6349_vm0 = vmmov 0   ;;  %v6350_v1 = vmov 0.0   ;;  %v539_v2 = vld [vmem:[%s7233_s2] sm:$0xff]  ;;  %v540_v3 = vld [vmem:[%s7233_s2 + $0x8] sm:$0xff] }
  0x43   : > { %6341 = vsyncadd (%p7264_p3), [#allocation5], 4294967280  ;;  %5994 = vmatprep.subr.bf16.mxu1 %v6348_v0  ;;  %5618 = vmatprep.mubr.msk.f32.mxu1 %vm6349_vm0, %v6350_v1  ;;  %v541_v4 = vld [vmem:[%s7233_s2 + $0x10] sm:$0xff]  ;;  %v6541_v5 = vpack.c.bf16 %v540_v3, %v539_v2  ;;  %v542_v6 = vld [vmem:[%s7233_s2 + $0x18] sm:$0xff]  ;;  %s6351_s21 = smov 96   ;;  %vm598_vm1 = vcmask 261120  }
  0x44   : > { %s7275_s19 = smov (!%p523_p9, %s6448_s19), 1  ;;  %v549_v7 = vld [vmem:[%s7237_s6] sm:$0xff]  ;;  %v550_v8 = vld [vmem:[%s7237_s6 + $0x8] sm:$0xff]  ;;  %v551_v9 = vld [vmem:[%s7237_s6 + $0x10] sm:$0xff]  ;;  %v6560_v11 = vpack.c.bf16 %v542_v6, %v541_v4  ;;  %vm763_vm2 = vcmask 64512   ;;  %s6352_s25 = smov 88  }
  0x45   : > { %s7249_s23 = sshll.u32 %s7275_s19, 3  ;;  %v552_v10 = vld [vmem:[%s7237_s6 + $0x18] sm:$0xff]  ;;  %5996 = vmatpush3.bf16.msra.mxu1 %v6541_v5  ;;  %v6153_v12 = vpack.i.bf16 %v550_v8, %v549_v7  ;;  %v6562_v13 = vpack.c.bf16 %v550_v8, %v549_v7  ;;  %s5432_s22 = sshll.u32 %s7275_s19, 4  ;;  %v6594_v27 = vld [vmem:[%s7234_s3] ss:$0 sm:$0xff]  ;;  %v6643_v60 = vld [vmem:[%s7235_s4 + $0x8] sm:$0xff] }
  0x46   : > { %v6564_v14 = vpack.c.bf16 %v552_v10, %v551_v9  ;;  %5997 = vmatprep.subr.bf16.mxu1 %v6348_v0  ;;  %s526_s17 = scalar_lea.vmem %s7231_s0, %s7249_s23  ;;  %v6158_v15 = vpack.i.bf16 %v552_v10, %v551_v9  ;;  %s531_s28 = scalar_lea.vmem %s7232_s1, %s5432_s22  ;;  %v6650_v2 = vld [vmem:[%s7235_s4] sm:$0xff]  ;;  %vm6737_vm3 = vmpackc.low %vm763_vm2, %vm763_vm2  ;;  %vm1901_vm4 = vcmask 130048   ;;  %vm2919_vm5 = vcmask 523264  }
  0x47   : > { %6154 = vrot.lane.b32.xlu0 %v6153_v12, %s6351_s21  ;;  %v6574_v16 = vld [vmem:[%s526_s17] sm:$0xff]  ;;  %v538_v26 = vld [vmem:[%s531_s28 + $0x8] sm:$0xff]  ;;  %s6353_s29 = smov 120   ;;  %s6354_s30 = smov 64  }
  0x48   : > { %v537_v17 = vld [vmem:[%s531_s28] sm:$0xff]  ;;  %s6355_s16 = smov 56   ;;  %s7255_s17 = smov 112  }
  0x49   : > { %5999 = vmatpush3.bf16.msra.mxu1 %v6560_v11  ;;  %5607 = vmatprep.mubr.msk.f32.mxu0 %vm598_vm1, %v537_v17  ;;  %s7257_s22 = smov 80   ;;  %s7254_s24 = smov 72  }
  0x4a   : > { %5636 = vmatprep.subr.mxu1 %v6350_v1  ;;  %s7252_s26 = smov 104   ;;  %s7251_s27 = smov 48  }
  0x4b   : > { %6159 = vrot.lane.b32.xlu0 %v6158_v15, %s6351_s21  ;;  %s7250_s23 = smov 40  }
  0x4c   : > { %5619 = vmatmul.mubr.msk.f32.vlgmr.msra.gmra.mrb[0].mxu1 %vm598_vm1, %v6574_v16 }
  0x4d   : > { %5638 = vmatprep.mubr.msk.f32.mxu1 %vm6349_vm0, %v6350_v1 }
  0xb9   : > { %v6155_v18 = vpop.permute.xlu0 %6154 }
  0xba   : > { %v6157_v19 = vunpack.i.h.bf16 %v6155_v18  ;;  %v6156_v20 = vunpack.i.l.bf16 %v6155_v18 }
  0xbc   : > { %v5986_v21 = vpack.c.bf16 %v6157_v19, %v6156_v20 }
  0xbd   : > { %v6160_v22 = vpop.permute.xlu0 %6159 }
  0xbe   : > { %v6162_v23 = vunpack.i.h.bf16 %v6160_v22  ;;  %v6161_v24 = vunpack.i.l.bf16 %v6160_v22  ;;  %5987 = vmatprep.subr.bf16.mxu0 %v5986_v21 }
  0xbf   : > { %5989 = vmatpush3.bf16.msra.mxu0 %v5986_v21 }
  0xc0   : > { %v5990_v25 = vpack.c.bf16 %v6162_v23, %v6161_v24 }
  0xc2   : > { %5991 = vmatprep.subr.bf16.mxu0 %v5990_v25 }
  0xc3   : > { %5993 = vmatpush3.bf16.msra.mxu0 %v5990_v25 }
  0xc4   : > { %5621 = vmatprep.subr.mxu0 %v6350_v1 }
  0xc6   : > { %5608 = vmatmul.mubr.msk.f32.vlgmr.msra.gmra.mrb[0].mxu0 %vm598_vm1, %v538_v26 }
  0xc7   : > { %5623 = vmatprep.mubr.msk.f32.mxu0 %vm6349_vm0, %v6350_v1 }
 0x11f   : > { %v755_v28 = vpop.f32.mrb[0].mxu1 }
 0x120   : > { %v6597_v29 = vadd.f32 %v6594_v27, %v755_v28  ;;  %v5620_v30 = vpop.f32.mrb[1].mxu1 }
 0x122   : > { %761 = vrot.lane.b32.xlu1 %v6597_v29, %s6351_s21  ;;  %v6603_v32 = vmul.f32 0.35355338, %v6597_v29 }
 0x194   : > { %v762_v31 = vpop.permute.xlu1 %761 }
 0x195   : > { %5622 = vmatpush3.xpose.msk.msra.mxu0 %vm763_vm2, %v762_v31 }
 0x196   : > { %5626 = vmatprep.subr.mxu0 %v6350_v1 }
 0x198   : > { %5624 = vmatmul.mubr.msk.f32.vlgmr.msra.gmra.mrb[2].mxu0 %vm763_vm2, %v6603_v32 }
 0x199   : > { %v6608_v33 = vpop.f32.mrb[0].mxu0  ;;  %5628 = vmatprep.mubr.msk.f32.mxu0 %vm6349_vm0, %v6350_v1 }
 0x19a   : > { %v6612_v34 = vpop.f32.mrb[1].mxu0 }
 0x26b   : > { %v835_v35 = vpop.f32.mrb[2].mxu0 }
 0x26c   : > { %v5625_v36 = vpop.f32.mrb[3].mxu0  ;;  %v839_v37 = vsel %vm763_vm2, %v835_v35, -inf }
 0x26d   : > { %840 = vmax.xlane.f32.xlu1 %v839_v37 }
 0x27e   : > { %928 = vrot.lane.b32.xlu1 %v6597_v29, %s6352_s25 }
 0x282   : > { %926 = vrot.lane.b32.xlu1 %v6603_v32, %s6353_s29 }
 0x2fa   : > { %v841_v38 = vpop.xlane.xlu1 %840 }
 0x2fb   : > { %v842_v39 = vsub.f32 %v835_v35, %v841_v38  ;;  %v6688_v35 = vld [vmem:[%s7235_s4 + $0x10] sm:$0xff] }
 0x2fd   : > { %v843_v40 = vmul.f32 1.442695, %v842_v39 }
 0x2fe   : > { %v929_v46 = vpop.permute.xlu1 %928 }
 0x2ff   : > { %6198 = vpow2.f32 %v843_v40 }
 0x302   : > { %v927_v48 = vpop.permute.xlu1 %926 }
 0x309   : > { %v6199_v41 = vpop.eup %6198 }
 0x30a   : > { %v845_v42 = vsel %vm763_vm2, %v6199_v41, 0.0 }
 0x30b   : > { %846 = vadd.xlane.f32.xlu0 %v845_v42 }
 0x321   : > { %850 = vrot.lane.b32.xlu0 %v6597_v29, %s6354_s30 }
 0x398   : > { %v847_v43 = vpop.xlane.xlu0 %846 }
 0x399   : > { %6200 = vrcp.f32 %v847_v43 }
 0x39c   : > { %v851_v44 = vpop.permute.xlu0 %850 }
 0x39d   : > { %5627 = vmatpush3.msra.mxu0 %v851_v44 }
 0x39e   : > { %5631 = vmatprep.subr.mxu0 %v6350_v1 }
 0x3a3   : > { %v6201_v45 = vpop.eup %6200 }
 0x3a4   : > { %v849_v47 = vmul.f32 %v6201_v45, %v6199_v41 }
 0x3a6   : > { %5629 = vmatmul.mubr.msk.f32.vlgmr.msra.gmra.mrb[4].mxu0 %vm763_vm2, %v849_v47  ;;  %v6703_v47 = vld [vmem:[%s7235_s4 + $0x18] sm:$0xff] }
 0x3a7   : > { %5632 = vmatpush3.xpose.msk.msra.mxu0 %vm763_vm2, %v929_v46  ;;  %5633 = vmatprep.mubr.msk.f32.mxu0 %vm6349_vm0, %v6350_v1 }
 0x3a8   : > { %5641 = vmatprep.subr.mxu0 %v6350_v1 }
 0x3aa   : > { %5634 = vmatmul.mubr.msk.f32.vlgmr.msra.gmra.mrb[6].mxu0 %vm763_vm2, %v927_v48 }
 0x3ab   : > { %5643 = vmatprep.mubr.msk.f32.mxu0 %vm6349_vm0, %v6350_v1  ;;  %5642 = vmatpush3.msra.mxu0 %v6643_v60 }
 0x3ac   : > { %5651 = vmatprep.subr.mxu0 %v6350_v1 }
 0x479   : > { %v922_v49 = vpop.f32.mrb[4].mxu0 }
 0x47a   : > { %v5630_v50 = vpop.f32.mrb[5].mxu0 }
 0x47d   : > { %v1000_v51 = vpop.f32.mrb[6].mxu0 }
 0x47e   : > { %v5635_v52 = vpop.f32.mrb[7].mxu0  ;;  %v1004_v53 = vsel %vm763_vm2, %v1000_v51, -inf }
 0x47f   : > { %1005 = vmax.xlane.f32.xlu0 %v1004_v53 }
 0x495   : > { %1015 = vrot.lane.b32.xlu0 %v6597_v29, %s6355_s16 }
 0x499   : > { %1237 = vrot.lane.b32.xlu0 %v6603_v32, %s7255_s17 }
 0x50c   : > { %v1006_v54 = vpop.xlane.xlu0 %1005 }
 0x50d   : > { %v1007_v55 = vsub.f32 %v1000_v51, %v1006_v54 }
 0x50f   : > { %v1008_v56 = vmul.f32 1.442695, %v1007_v55  ;;  %v6720_v55 = vld [vmem:[%s7236_s5] ss:$0 sm:$0xff] }
 0x510   : > { %v1016_v57 = vpop.permute.xlu0 %1015 }
 0x511   : > { %6202 = vpow2.f32 %v1008_v56  ;;  %5637 = vmatpush3.msra.mxu1 %v1016_v57 }
 0x512   : > { %5646 = vmatprep.subr.mxu1 %v6350_v1 }
 0x514   : > { %v1238_v7 = vpop.permute.xlu0 %1237 }
 0x51b   : > { %v6203_v58 = vpop.eup %6202 }
 0x51c   : > { %v1010_v59 = vsel %vm763_vm2, %v6203_v58, 0.0 }
 0x51d   : > { %1011 = vadd.xlane.f32.xlu1 %v1010_v59 }
 0x52e   : > { %1239 = vrot.lane.b32.xlu1 %v6597_v29, %s7257_s22 }
 0x5aa   : > { %v1012_v61 = vpop.xlane.xlu1 %1011 }
 0x5ab   : > { %6204 = vrcp.f32 %v1012_v61 }
 0x5ae   : > { %v1240_v4 = vpop.permute.xlu1 %1239 }
 0x5b5   : > { %v6205_v62 = vpop.eup %6204 }
 0x5b6   : > { %v1014_v63 = vmul.f32 %v6205_v62, %v6203_v58 }
 0x5b8   : > { %5639 = vmatmul.mubr.msk.f32.vlgmr.msra.gmra.mrb[2].mxu1 %vm763_vm2, %v1014_v63 }
 0x5b9   : > { %5647 = vmatpush3.msra.mxu1 %v6650_v2  ;;  %5648 = vmatprep.mubr.msk.f32.mxu1 %vm6349_vm0, %v6350_v1 }
 0x5ba   : > { %5656 = vmatprep.subr.mxu1 %v6350_v1 }
 0x5bc   : > { %5649 = vmatmul.mubr.msk.f32.vlgmr.msra.gmra.mrb[4].mxu1 %vm763_vm2, %v922_v49 }
 0x5bd   : > { %5658 = vmatprep.mubr.msk.f32.mxu1 %vm6349_vm0, %v6350_v1 }
 0x68b   : > { %v1087_v3 = vpop.f32.mrb[2].mxu1 }
 0x68c   : > { %v5640_v6 = vpop.f32.mrb[3].mxu1  ;;  %5644 = vmatmul.mubr.msk.f32.vlgmr.msra.gmra.mrb[8].mxu0 %vm763_vm2, %v1087_v3 }
 0x68d   : > { %5652 = vmatpush3.xpose.msk.msra.mxu0 %vm763_vm2, %v1240_v4  ;;  %5653 = vmatprep.mubr.msk.f32.mxu0 %vm6349_vm0, %v6350_v1 }
 0x68e   : > { %5661 = vmatprep.subr.mxu0 %v6350_v1 }
 0x68f   : > { %v1233_v8 = vpop.f32.mrb[4].mxu1 }
 0x690   : > { %v5650_v9 = vpop.f32.mrb[5].mxu1  ;;  %5654 = vmatmul.mubr.msk.f32.vlgmr.msra.gmra.mrb[10].mxu0 %vm763_vm2, %v1238_v7 }
 0x691   : > { %5663 = vmatprep.mubr.msk.f32.mxu0 %vm6349_vm0, %v6350_v1  ;;  %5662 = vmatpush3.msra.mxu0 %v6688_v35 }
 0x692   : > { %5671 = vmatprep.subr.mxu0 %v6350_v1 }
 0x75f   : > { %v1160_v10 = vpop.f32.mrb[8].mxu0 }
 0x760   : > { %v1234_v12 = vadd.f32 %v1233_v8, %v1160_v10  ;;  %v5645_v15 = vpop.f32.mrb[9].mxu0  ;;  %v6729_v8 = vld [vmem:[%s7238_s7] ss:$0 sm:$0xff]  ;;  %v1737_v10 = vlaneseq }
 0x763   : > { %v1311_v17 = vpop.f32.mrb[10].mxu0 }
 0x764   : > { %v5655_v18 = vpop.f32.mrb[11].mxu0  ;;  %v1315_v19 = vsel %vm763_vm2, %v1311_v17, -inf }
 0x765   : > { %1316 = vmax.xlane.f32.xlu1 %v1315_v19 }
 0x776   : > { %1478 = vrot.lane.b32.xlu1 %v6597_v29, %s7254_s24 }
 0x77a   : > { %1476 = vrot.lane.b32.xlu1 %v6603_v32, %s7252_s26 }
 0x7f2   : > { %v1317_v20 = vpop.xlane.xlu1 %1316 }
 0x7f3   : > { %v1318_v21 = vsub.f32 %v1311_v17, %v1317_v20  ;;  %v6741_v20 = vshrl.u32 %v1737_v10, 7 }
 0x7f5   : > { %v1319_v22 = vmul.f32 1.442695, %v1318_v21 }
 0x7f6   : > { %v1479_v30 = vpop.permute.xlu1 %1478 }
 0x7f7   : > { %6206 = vpow2.f32 %v1319_v22 }
 0x7fa   : > { %v1477_v32 = vpop.permute.xlu1 %1476 }
 0x801   : > { %v6207_v23 = vpop.eup %6206 }
 0x802   : > { %v1321_v24 = vsel %vm763_vm2, %v6207_v23, 0.0 }
 0x803   : > { %1322 = vadd.xlane.f32.xlu0 %v1321_v24 }
 0x819   : > { %1326 = vrot.lane.b32.xlu0 %v6597_v29, %s7251_s27  ;;  %s7272_s27 = smov 40  }
 0x890   : > { %v1323_v25 = vpop.xlane.xlu0 %1322 }
 0x891   : > { %6208 = vrcp.f32 %v1323_v25 }
 0x894   : > { %v1327_v26 = vpop.permute.xlu0 %1326 }
 0x895   : > { %5657 = vmatpush3.msra.mxu1 %v1327_v26 }
 0x896   : > { %5666 = vmatprep.subr.mxu1 %v6350_v1 }
 0x89b   : > { %v6209_v28 = vpop.eup %6208 }
 0x89c   : > { %v1325_v31 = vmul.f32 %v6209_v28, %v6207_v23  ;;  %v1744_v23 = vsub.s32 1, %v6741_v20 }
 0x89e   : > { %5659 = vmatmul.mubr.msk.f32.vlgmr.msra.gmra.mrb[6].mxu1 %vm763_vm2, %v1325_v31 }
 0x89f   : > { %5667 = vmatpush3.xpose.msk.msra.mxu1 %vm763_vm2, %v1479_v30  ;;  %5668 = vmatprep.mubr.msk.f32.mxu1 %vm6349_vm0, %v6350_v1 }
 0x8a0   : > { %5676 = vmatprep.subr.mxu1 %v6350_v1 }
 0x8a2   : > { %5669 = vmatmul.mubr.msk.f32.vlgmr.msra.gmra.mrb[8].mxu1 %vm763_vm2, %v1477_v32 }
 0x8a3   : > { %5678 = vmatprep.mubr.msk.f32.mxu1 %vm6349_vm0, %v6350_v1  ;;  %5677 = vmatpush3.msra.mxu1 %v6703_v47 }
 0x8a4   : > { %6006 = vmatprep.subr.bf16.mxu1 %v6348_v0 }
 0x971   : > { %v1398_v36 = vpop.f32.mrb[6].mxu1 }
 0x972   : > { %v5660_v37 = vpop.f32.mrb[7].mxu1  ;;  %5664 = vmatmul.mubr.msk.f32.vlgmr.msra.gmra.mrb[12].mxu0 %vm763_vm2, %v1398_v36 }
 0x973   : > { %5673 = vmatprep.mubr.msk.f32.mxu0 %vm6349_vm0, %v6350_v1 }
 0x975   : > { %v1550_v38 = vpop.f32.mrb[8].mxu1 }
 0x976   : > { %v5670_v39 = vpop.f32.mrb[9].mxu1  ;;  %v1554_v40 = vsel %vm763_vm2, %v1550_v38, -inf }
 0x977   : > { %1555 = vmax.xlane.f32.xlu0 %v1554_v40 }
 0x98d   : > { %1565 = vrot.lane.b32.xlu0 %v6597_v29, %s7250_s23  ;;  %s7271_s23 = smov 48  }
 0xa04   : > { %v1556_v41 = vpop.xlane.xlu0 %1555 }
 0xa05   : > { %v1557_v42 = vsub.f32 %v1550_v38, %v1556_v41 }
 0xa07   : > { %v1558_v43 = vmul.f32 1.442695, %v1557_v42 }
 0xa08   : > { %v1566_v44 = vpop.permute.xlu0 %1565 }
 0xa09   : > { %6210 = vpow2.f32 %v1558_v43  ;;  %5672 = vmatpush3.msra.mxu0 %v1566_v44 }
 0xa0a   : > { %6000 = vmatprep.subr.bf16.mxu0 %v6348_v0 }
 0xa13   : > { %v6211_v45 = vpop.eup %6210 }
 0xa14   : > { %v1560_v46 = vsel %vm763_vm2, %v6211_v45, 0.0 }
 0xa15   : > { %1561 = vadd.xlane.f32.xlu1 %v1560_v46 }
 0xa45   : > { %v1471_v29 = vpop.f32.mrb[12].mxu0 }
 0xa46   : > { %v1475_v48 = vadd.f32 %v1471_v29, %v1234_v12  ;;  %v5665_v49 = vpop.f32.mrb[13].mxu0 }
 0xaa2   : > { %v1562_v50 = vpop.xlane.xlu1 %1561 }
 0xaa3   : > { %6212 = vrcp.f32 %v1562_v50 }
 0xaad   : > { %v6213_v51 = vpop.eup %6212 }
 0xaae   : > { %v1564_v52 = vmul.f32 %v6213_v51, %v6211_v45 }
 0xab0   : > { %5674 = vmatmul.mubr.msk.f32.vlgmr.msra.gmra.mrb[14].mxu0 %vm763_vm2, %v1564_v52 }
 0xab1   : > { %6002 = vmatpush3.bf16.msra.mxu0 %v6562_v13  ;;  %5689 = vmatprep.mubr.msk.f32.mxu0 %vm6349_vm0, %v6350_v1 }
 0xab2   : > { %6003 = vmatprep.subr.bf16.mxu0 %v6348_v0 }
 0xab5   : > { %6005 = vmatpush3.bf16.msra.mxu0 %v6564_v14 }
 0xab6   : > { %6010 = vmatprep.subr.bf16.mxu0 %v6348_v0 }
 0xb83   : > { %v1637_v53 = vpop.f32.mrb[14].mxu0 }
 0xb84   : > { %v5675_v54 = vpop.f32.mrb[15].mxu0  ;;  %5679 = vmatmul.mubr.msk.f32.vlgmr.msra.gmra.mrb[10].mxu1 %vm763_vm2, %v1637_v53 }
 0xb85   : > { %5696 = vmatprep.mubr.msk.f32.mxu1 %vm6349_vm0, %v6350_v1 }
 0xc57   : > { %v1710_v56 = vpop.f32.mrb[10].mxu1 }
 0xc58   : > { %v1714_v57 = vadd.f32 %v1710_v56, %v1475_v48  ;;  %v5680_v58 = vpop.f32.mrb[11].mxu1 }
 0xc5a   : > { %v1721_v59 = vadd.f32 %v6720_v55, %v1714_v57 }
 0xc5c   : > { %v1722_v61 = vadd.f32 %v1721_v59, %v6574_v16 }
 0xc5e   : > { %v1723_v62 = vsel %vm598_vm1, %v1722_v61, 0.0 }
 0xc5f   : > { %1724 = vadd.xlane.f32.xlu1 %v1723_v62 }
 0xcec   : > { %v1725_v63 = vpop.xlane.xlu1 %1724 }
 0xced   : > { %v1727_v3 = vmul.f32 0.03125, %v1725_v63 }
 0xcef   : > { %v1728_v4 = vsub.f32 %v1722_v61, %v1727_v3 }
 0xcf1   : > { %v1729_v6 = vmul.f32 %v1728_v4, %v1728_v4 }
 0xcf3   : > { %v1730_v7 = vsel %vm598_vm1, %v1729_v6, 0.0 }
 0xcf4   : > { %1731 = vadd.xlane.f32.xlu1 %v1730_v7 }
 0xd05   : > { %595 = vrot.lane.b32.xlu1 %v6729_v8, %s6351_s21 }
 0xd81   : > { %v1732_v9 = vpop.xlane.xlu1 %1731 }
 0xd82   : > { %v1733_v16 = vmul.f32 0.03125, %v1732_v9 }
 0xd84   : > { %v1734_v12 = vadd.f32 1e-05, %v1733_v16  ;;  %v6812_v16 = vld [vmem:[%s7239_s8] sm:$0xff] }
 0xd85   : > { %v596_v15 = vpop.permute.xlu1 %595 }
 0xd86   : > { %6214 = vrsqrt.f32 %v1734_v12  ;;  %v672_v17 = vadd.f32 %v6612_v34, %v596_v15  ;;  %v677_v18 = vadd.f32 %v6608_v33, %v596_v15  ;;  %v1739_v33 = vsub.s32 0, %v6741_v20  ;;  %v6757_v34 = vld [vmem:[%s7245_s14] sm:$0x3f] }
 0xd87   : > { %v6764_v28 = vrot.slane %v6757_v34, %v1744_v23 }
 0xd88   : > { %v6743_v21 = vpack.i.bf16 %v677_v18, %v672_v17  ;;  %v6745_v22 = vpack.c.bf16 %v677_v18, %v672_v17  ;;  %v6761_v24 = vrot.slane %v6757_v34, %v1739_v33 }
 0xd8a   : > { %6164 = vrot.lane.b32.xlu0 %v6743_v21, %s6353_s29  ;;  %6009 = vmatpush3.bf16.xpose.msk.msra.mxu1 %vm6737_vm3, %v6745_v22 }
 0xd8b   : > { %6013 = vmatprep.subr.bf16.mxu1 %v6348_v0 }
 0xd90   : > { %v6215_v25 = vpop.eup %6214 }
 0xd91   : > { %v1736_v26 = vmul.f32 %v6215_v25, %v1728_v4  ;;  %v6823_v25 = vld [vmem:[%s7239_s8 + $0x8] sm:$0xff] }
 0xd93   : > { %v1741_v30 = vmul.f32 %v6761_v24, %v1736_v26 }
 0xd95   : > { %v6768_v31 = vadd.f32 %v6764_v28, %v1741_v30 }
 0xd97   : > { %5690 = vmatmul.mubr.msk.f32.vlgmr.msra.gmra.mrb[16].mxu0 %vm598_vm1, %v6768_v31 }
 0xd98   : > { %5703 = vmatprep.mubr.msk.f32.mxu0 %vm6349_vm0, %v6350_v1 }
 0xdfc   : > { %v6165_v32 = vpop.permute.xlu0 %6164 }
 0xdfd   : > { %v6167_v36 = vunpack.i.h.bf16 %v6165_v32  ;;  %v6166_v37 = vunpack.i.l.bf16 %v6165_v32 }
 0xdff   : > { %v6775_v42 = vpack.c.bf16 %v6167_v36, %v6166_v37 }
 0xe6a   : > { %v1817_v38 = vpop.f32.mrb[16].mxu0 }
 0xe6b   : > { %v1818_v39 = vadd.f32 %v6729_v8, %v1817_v38  ;;  %v5691_v40 = vpop.f32.mrb[17].mxu0 }
 0xe6d   : > { %v1821_v41 = vmul.f32 0.35355338, %v1818_v39 }
 0xe6f   : > { %1992 = vrot.lane.b32.xlu0 %v1821_v41, %s6353_s29  ;;  %5697 = vmatmul.mubr.msk.f32.vlgmr.msra.gmra.mrb[12].mxu1 %vm763_vm2, %v1821_v41 }
 0xe70   : > { %6016 = vmatpush3.bf16.xpose.msk.msra.mxu1 %vm6737_vm3, %v6775_v42  ;;  %5710 = vmatprep.mubr.msk.f32.mxu1 %vm6349_vm0, %v6350_v1 }
 0xe71   : > { %5725 = vmatprep.subr.mxu1 %v6350_v1 }
 0xee1   : > { %v1993_v43 = vpop.permute.xlu0 %1992 }
 0xee2   : > { %5711 = vmatmul.mubr.msk.f32.vlgmr.msra.gmra.mrb[14].mxu1 %vm763_vm2, %v1993_v43 }
 0xee3   : > { %5727 = vmatprep.mubr.msk.f32.mxu1 %vm6349_vm0, %v6350_v1  ;;  %5726 = vmatpush3.msra.mxu1 %v6812_v16 }
 0xee4   : > { %6024 = vmatprep.subr.bf16.mxu1 %v6348_v0 }
 0xf42   : > { %v1897_v44 = vpop.f32.mrb[12].mxu1 }
 0xf43   : > { %v5698_v45 = vpop.f32.mrb[13].mxu1  ;;  %v1902_v46 = vsel %vm1901_vm4, %v1897_v44, -inf }
 0xf44   : > { %1903 = vmax.xlane.f32.xlu0 %v1902_v46 }
 0xfb5   : > { %v2070_v29 = vpop.f32.mrb[14].mxu1 }
 0xfb6   : > { %v5712_v48 = vpop.f32.mrb[15].mxu1  ;;  %v2074_v49 = vsel %vm1901_vm4, %v2070_v29, -inf }
 0xfb7   : > { %2075 = vmax.xlane.f32.xlu1 %v2074_v49 }
 0xfc8   : > { %6169 = vrot.lane.b32.xlu1 %v6743_v21, %s6351_s21 }
 0xfcc   : > { %6179 = vrot.lane.b32.xlu1 %v6743_v21, %s7255_s17 }
 0xfd0   : > { %2310 = vrot.lane.b32.xlu1 %v1821_v41, %s7255_s17 }
 0xfd1   : > { %v1904_v50 = vpop.xlane.xlu0 %1903 }
 0xfd2   : > { %v1905_v51 = vsub.f32 %v1897_v44, %v1904_v50 }
 0xfd4   : > { %v1906_v52 = vmul.f32 1.442695, %v1905_v51  ;;  %2556 = vrot.lane.b32.xlu1 %v1821_v41, %s7252_s26 }
 0xfd6   : > { %6216 = vpow2.f32 %v1906_v52 }
 0xfe0   : > { %v6217_v53 = vpop.eup %6216 }
 0xfe1   : > { %v1908_v54 = vsel %vm1901_vm4, %v6217_v53, 0.0 }
 0xfe2   : > { %1909 = vadd.xlane.f32.xlu0 %v1908_v54 }
0x1044   : > { %v2076_v56 = vpop.xlane.xlu1 %2075 }
0x1045   : > { %v2077_v57 = vsub.f32 %v2070_v29, %v2076_v56 }
0x1047   : > { %v2078_v58 = vmul.f32 1.442695, %v2077_v57 }
0x1048   : > { %v6170_v59 = vpop.permute.xlu1 %6169 }
0x1049   : > { %6218 = vpow2.f32 %v2078_v58  ;;  %v6172_v61 = vunpack.i.h.bf16 %v6170_v59  ;;  %v6171_v62 = vunpack.i.l.bf16 %v6170_v59 }
0x104b   : > { %v6797_v63 = vpack.c.bf16 %v6172_v61, %v6171_v62 }
0x104c   : > { %v6180_v32 = vpop.permute.xlu1 %6179 }
0x104d   : > { %6012 = vmatpush3.bf16.msra.mxu0 %v6797_v63  ;;  %v6182_v36 = vunpack.i.h.bf16 %v6180_v32  ;;  %v6181_v37 = vunpack.i.l.bf16 %v6180_v32 }
0x104e   : > { %6017 = vmatprep.subr.bf16.mxu0 %v6348_v0 }
0x104f   : > { %v6833_v38 = vpack.c.bf16 %v6182_v36, %v6181_v37  ;;  %v6872_v37 = vld [vmem:[%s7239_s8 + $0x10] sm:$0xff] }
0x1050   : > { %v2311_v45 = vpop.permute.xlu1 %2310 }
0x1053   : > { %v6219_v3 = vpop.eup %6218 }
0x1054   : > { %v2080_v4 = vsel %vm1901_vm4, %v6219_v3, 0.0  ;;  %v2557_v29 = vpop.permute.xlu1 %2556 }
0x1055   : > { %2081 = vadd.xlane.f32.xlu0 %v2080_v4 }
0x106b   : > { %6174 = vrot.lane.b32.xlu0 %v6743_v21, %s6352_s25 }
0x106f   : > { %v1910_v6 = vpop.xlane.xlu0 %1909  ;;  %6184 = vrot.lane.b32.xlu0 %v6743_v21, %s7252_s26 }
0x1070   : > { %6220 = vrcp.f32 %v1910_v6 }
0x107a   : > { %v6221_v7 = vpop.eup %6220 }
0x107b   : > { %v1912_v9 = vmul.f32 %v6221_v7, %v6217_v53 }
0x107d   : > { %5704 = vmatmul.mubr.msk.f32.vlgmr.msra.gmra.mrb[18].mxu0 %vm1901_vm4, %v1912_v9 }
0x107e   : > { %5717 = vmatprep.mubr.msk.f32.mxu0 %vm6349_vm0, %v6350_v1 }
0x10e2   : > { %v2082_v10 = vpop.xlane.xlu0 %2081 }
0x10e3   : > { %6222 = vrcp.f32 %v2082_v10 }
0x10e6   : > { %v6175_v12 = vpop.permute.xlu0 %6174 }
0x10e7   : > { %v6177_v15 = vunpack.i.h.bf16 %v6175_v12  ;;  %v6176_v17 = vunpack.i.l.bf16 %v6175_v12 }
0x10e9   : > { %v6816_v18 = vpack.c.bf16 %v6177_v15, %v6176_v17 }
0x10ea   : > { %v6185_v40 = vpop.permute.xlu0 %6184 }
0x10eb   : > { %6019 = vmatpush3.bf16.msra.mxu0 %v6816_v18  ;;  %v6187_v43 = vunpack.i.h.bf16 %v6185_v40  ;;  %v6186_v44 = vunpack.i.l.bf16 %v6185_v40 }
0x10ec   : > { %5720 = vmatprep.subr.mxu0 %v6350_v1 }
0x10ed   : > { %v6223_v33 = vpop.eup %6222  ;;  %v6842_v46 = vpack.c.bf16 %v6187_v43, %v6186_v44 }
0x10ee   : > { %v2084_v23 = vmul.f32 %v6223_v33, %v6219_v3 }
0x10f0   : > { %5718 = vmatmul.mubr.msk.f32.vlgmr.msra.gmra.mrb[20].mxu0 %vm1901_vm4, %v2084_v23 }
0x10f1   : > { %5721 = vmatpush3.msra.mxu0 %v6823_v25  ;;  %5722 = vmatprep.mubr.msk.f32.mxu0 %vm6349_vm0, %v6350_v1 }
0x10f2   : > { %6020 = vmatprep.subr.bf16.mxu0 %v6348_v0 }
0x1150   : > { %v1988_v26 = vpop.f32.mrb[18].mxu0 }
0x1151   : > { %v5705_v30 = vpop.f32.mrb[19].mxu0  ;;  %5728 = vmatmul.mubr.msk.f32.vlgmr.msra.gmra.mrb[16].mxu1 %vm763_vm2, %v1988_v26 }
0x1152   : > { %5741 = vmatprep.mubr.msk.f32.mxu1 %vm6349_vm0, %v6350_v1 }
0x11c3   : > { %v2160_v39 = vpop.f32.mrb[20].mxu0 }
0x11c4   : > { %v5719_v41 = vpop.f32.mrb[21].mxu0  ;;  %5723 = vmatmul.mubr.msk.f32.vlgmr.msra.gmra.mrb[22].mxu0 %vm763_vm2, %v2160_v39 }
0x11c5   : > { %6023 = vmatpush3.bf16.xpose.msk.msra.mxu0 %vm6737_vm3, %v6833_v38  ;;  %5734 = vmatprep.mubr.msk.f32.mxu0 %vm6349_vm0, %v6350_v1 }
0x11c6   : > { %6027 = vmatprep.subr.bf16.mxu0 %v6348_v0 }
0x11cc   : > { %5735 = vmatmul.mubr.msk.f32.vlgmr.msra.gmra.mrb[24].mxu0 %vm763_vm2, %v2311_v45 }
0x11cd   : > { %6030 = vmatpush3.bf16.xpose.msk.msra.mxu0 %vm6737_vm3, %v6842_v46  ;;  %5753 = vmatprep.mubr.msk.f32.mxu0 %vm6349_vm0, %v6350_v1 }
0x11ce   : > { %6034 = vmatprep.subr.bf16.mxu0 %v6348_v0 }
0x11d4   : > { %5754 = vmatmul.mubr.msk.f32.vlgmr.msra.gmra.mrb[26].mxu0 %vm763_vm2, %v2557_v29 }
0x11d5   : > { %5776 = vmatprep.mubr.msk.f32.mxu0 %vm6349_vm0, %v6350_v1 }
0x1224   : > { %v2306_v48 = vpop.f32.mrb[16].mxu1 }
0x1225   : > { %v5729_v49 = vpop.f32.mrb[17].mxu1 }
0x1226   : > { %v6889_v49 = vld [vmem:[%s7239_s8 + $0x18] sm:$0xff] }
0x1297   : > { %v2233_v50 = vpop.f32.mrb[22].mxu0 }
0x1298   : > { %v2307_v51 = vadd.f32 %v2306_v48, %v2233_v50  ;;  %v5724_v52 = vpop.f32.mrb[23].mxu0 }
0x129f   : > { %v2388_v53 = vpop.f32.mrb[24].mxu0 }
0x12a0   : > { %v5736_v54 = vpop.f32.mrb[25].mxu0  ;;  %v2392_v56 = vsel %vm1901_vm4, %v2388_v53, -inf }
0x12a1   : > { %2393 = vmax.xlane.f32.xlu0 %v2392_v56 }
0x12a7   : > { %v2634_v57 = vpop.f32.mrb[26].mxu0 }
0x12a8   : > { %v5755_v58 = vpop.f32.mrb[27].mxu0  ;;  %v2638_v12 = vsel %vm1901_vm4, %v2634_v57, -inf }
0x12b7   : > { %6189 = vrot.lane.b32.xlu0 %v6743_v21, %s7257_s22 }
0x132e   : > { %v2394_v59 = vpop.xlane.xlu0 %2393 }
0x132f   : > { %v2395_v61 = vsub.f32 %v2388_v53, %v2394_v59 }
0x1331   : > { %v2396_v62 = vmul.f32 1.442695, %v2395_v61 }
0x1332   : > { %v6190_v3 = vpop.permute.xlu0 %6189 }
0x1333   : > { %6224 = vpow2.f32 %v2396_v62  ;;  %v6192_v4 = vunpack.i.h.bf16 %v6190_v3  ;;  %v6191_v6 = vunpack.i.l.bf16 %v6190_v3 }
0x1335   : > { %v6857_v7 = vpack.c.bf16 %v6192_v4, %v6191_v6 }
0x1337   : > { %6026 = vmatpush3.bf16.msra.mxu1 %v6857_v7 }
0x1338   : > { %5744 = vmatprep.subr.mxu1 %v6350_v1 }
0x133d   : > { %v6225_v9 = vpop.eup %6224 }
0x133e   : > { %v2398_v10 = vsel %vm1901_vm4, %v6225_v9, 0.0 }
0x133f   : > { %2399 = vadd.xlane.f32.xlu1 %v2398_v10 }
0x1343   : > { %2639 = vmax.xlane.f32.xlu1 %v2638_v12 }
0x13cc   : > { %v2400_v15 = vpop.xlane.xlu1 %2399 }
0x13cd   : > { %6226 = vrcp.f32 %v2400_v15  ;;  %v559_v15 = vld [vmem:[%s7241_s10] sm:$0xff] }
0x13d0   : > { %v2640_v17 = vpop.xlane.xlu1 %2639 }
0x13d1   : > { %v2641_v33 = vsub.f32 %v2634_v57, %v2640_v17  ;;  %v6899_v57 = vld [vmem:[%s7240_s9] ss:$0 sm:$0xff]  ;;  %v560_v17 = vld [vmem:[%s7241_s10 + $0x8] sm:$0xff] }
0x13d3   : > { %v2642_v23 = vmul.f32 1.442695, %v2641_v33  ;;  %v6911_v33 = vpack.c.bf16 %v560_v17, %v559_v15 }
0x13d5   : > { %6228 = vpow2.f32 %v2642_v23  ;;  %6036 = vmatpush3.bf16.msra.mxu0 %v6911_v33  ;;  %v562_v23 = vld [vmem:[%s7241_s10 + $0x18] sm:$0xff] }
0x13d6   : > { %6037 = vmatprep.subr.bf16.mxu0 %v6348_v0 }
0x13d7   : > { %v6227_v26 = vpop.eup %6226 }
0x13d8   : > { %v2402_v30 = vmul.f32 %v6227_v26, %v6225_v9 }
0x13da   : > { %5742 = vmatmul.mubr.msk.f32.vlgmr.msra.gmra.mrb[18].mxu1 %vm1901_vm4, %v2402_v30  ;;  %v564_v30 = vld [vmem:[%s7243_s12] sm:$0xff] }
0x13db   : > { %5746 = vmatprep.mubr.msk.f32.mxu1 %vm6349_vm0, %v6350_v1  ;;  %5745 = vmatpush3.msra.mxu1 %v6872_v37 }
0x13dc   : > { %6031 = vmatprep.subr.bf16.mxu1 %v6348_v0 }
0x13df   : > { %v6229_v32 = vpop.eup %6228 }
0x13e0   : > { %v2644_v36 = vsel %vm1901_vm4, %v6229_v32, 0.0 }
0x13e1   : > { %2645 = vadd.xlane.f32.xlu1 %v2644_v36  ;;  %v566_v36 = vld [vmem:[%s7243_s12 + $0x10] sm:$0xff] }
0x13f2   : > { %6194 = vrot.lane.b32.xlu1 %v6743_v21, %s7254_s24 }
0x146e   : > { %v2646_v39 = vpop.xlane.xlu1 %2645 }
0x146f   : > { %6230 = vrcp.f32 %v2646_v39 }
0x1472   : > { %v6195_v40 = vpop.permute.xlu1 %6194 }
0x1473   : > { %v6197_v41 = vunpack.i.h.bf16 %v6195_v40  ;;  %v6196_v43 = vunpack.i.l.bf16 %v6195_v40  ;;  %v567_v40 = vld [vmem:[%s7243_s12 + $0x18] sm:$0xff] }
0x1475   : > { %v6876_v45 = vpack.c.bf16 %v6197_v41, %v6196_v43  ;;  %v6940_v41 = vpack.c.bf16 %v567_v40, %v566_v36  ;;  %v568_v43 = vld [vmem:[%s7243_s12 + $0x20] sm:$0xff] }
0x1479   : > { %v6231_v44 = vpop.eup %6230 }
0x147a   : > { %v2648_v21 = vmul.f32 %v6231_v44, %v6229_v32  ;;  %v565_v32 = vld [vmem:[%s7243_s12 + $0x8] sm:$0xff] }
0x147b   : > { %v6934_v39 = vpack.c.bf16 %v565_v32, %v564_v30  ;;  %v569_v44 = vld [vmem:[%s7243_s12 + $0x28] sm:$0xff] }
0x14ad   : > { %v2478_v29 = vpop.f32.mrb[18].mxu1 }
0x14ae   : > { %v5743_v48 = vpop.f32.mrb[19].mxu1  ;;  %5747 = vmatmul.mubr.msk.f32.vlgmr.msra.gmra.mrb[20].mxu1 %vm763_vm2, %v2478_v29  ;;  %v6950_v29 = vpack.c.bf16 %v569_v44, %v568_v43 }
0x14af   : > { %6033 = vmatpush3.bf16.msra.mxu1 %v6876_v45  ;;  %5760 = vmatprep.mubr.msk.f32.mxu1 %vm6349_vm0, %v6350_v1 }
0x14b0   : > { %5763 = vmatprep.subr.mxu1 %v6350_v1 }
0x14b2   : > { %5761 = vmatmul.mubr.msk.f32.vlgmr.msra.gmra.mrb[22].mxu1 %vm1901_vm4, %v2648_v21 }
0x14b3   : > { %5765 = vmatprep.mubr.msk.f32.mxu1 %vm6349_vm0, %v6350_v1  ;;  %5764 = vmatpush3.msra.mxu1 %v6889_v49 }
0x14b4   : > { %6040 = vmatprep.subr.bf16.mxu1 %v6348_v0 }
0x1581   : > { %v2551_v50 = vpop.f32.mrb[20].mxu1 }
0x1582   : > { %v2555_v52 = vadd.f32 %v2551_v50, %v2307_v51  ;;  %v5748_v53 = vpop.f32.mrb[21].mxu1 }
0x1583   : > { %v2830_v53 = vsub.s32 3, %v6741_v20 }
0x1585   : > { %v2724_v54 = vpop.f32.mrb[22].mxu1 }
0x1586   : > { %v5762_v56 = vpop.f32.mrb[23].mxu1  ;;  %5766 = vmatmul.mubr.msk.f32.vlgmr.msra.gmra.mrb[24].mxu1 %vm763_vm2, %v2724_v54 }
0x1587   : > { %5795 = vmatprep.mubr.msk.f32.mxu1 %vm6349_vm0, %v6350_v1  ;;  %6042 = vmatpush3.bf16.msra.mxu1 %v6934_v39 }
0x1588   : > { %6043 = vmatprep.subr.bf16.mxu1 %v6348_v0 }
0x158b   : > { %6045 = vmatpush3.bf16.msra.mxu1 %v6940_v41 }
0x158c   : > { %6046 = vmatprep.subr.bf16.mxu1 %v6348_v0 }
0x158f   : > { %6048 = vmatpush3.bf16.msra.mxu1 %v6950_v29 }
0x1590   : > { %6049 = vmatprep.subr.bf16.mxu1 %v6348_v0 }
0x1659   : > { %v2797_v58 = vpop.f32.mrb[24].mxu1 }
0x165a   : > { %v2801_v59 = vadd.f32 %v2797_v58, %v2555_v52  ;;  %v5767_v61 = vpop.f32.mrb[25].mxu1  ;;  %v2825_v52 = vsub.s32 2, %v6741_v20 }
0x165c   : > { %v2808_v62 = vadd.f32 %v6899_v57, %v2801_v59  ;;  %v6958_v54 = vrot.slane %v6757_v34, %v2825_v52  ;;  %v6961_v59 = vrot.slane %v6757_v34, %v2830_v53  ;;  %v3009_v52 = vsub.s32 4, %v6741_v20 }
0x165d   : > { %v3014_v53 = vsub.s32 5, %v6741_v20 }
0x165e   : > { %v2809_v51 = vadd.f32 %v2808_v62, %v6768_v31  ;;  %v561_v31 = vld [vmem:[%s7241_s10 + $0x10] sm:$0xff] }
0x165f   : > { %v6921_v26 = vpack.c.bf16 %v562_v23, %v561_v31 }
0x1660   : > { %v2810_v3 = vsel %vm598_vm1, %v2809_v51, 0.0 }
0x1661   : > { %2811 = vadd.xlane.f32.xlu0 %v2810_v3  ;;  %6039 = vmatpush3.bf16.msra.mxu0 %v6921_v26  ;;  %v571_v3 = vld [vmem:[%s7243_s12 + $0x38] sm:$0xff] }
0x1662   : > { %6052 = vmatprep.subr.bf16.mxu0 %v6348_v0 }
0x16ee   : > { %v2812_v4 = vpop.xlane.xlu0 %2811 }
0x16ef   : > { %v2813_v6 = vmul.f32 0.03125, %v2812_v4 }
0x16f1   : > { %v2814_v9 = vsub.f32 %v2809_v51, %v2813_v6  ;;  %v570_v51 = vld [vmem:[%s7243_s12 + $0x30] sm:$0xff] }
0x16f2   : > { %v6978_v4 = vpack.c.bf16 %v571_v3, %v570_v51 }
0x16f3   : > { %v2815_v10 = vmul.f32 %v2814_v9, %v2814_v9 }
0x16f4   : > { %6051 = vmatpush3.bf16.msra.mxu1 %v6978_v4 }
0x16f5   : > { %v2816_v12 = vsel %vm598_vm1, %v2815_v10, 0.0  ;;  %5814 = vmatprep.subr.mxu1 %v6350_v1 }
0x16f6   : > { %2817 = vadd.xlane.f32.xlu1 %v2816_v12  ;;  %v6988_v12 = vld [vmem:[#allocation4] ss:$0 sm:$0xff] }
0x1783   : > { %v2818_v48 = vpop.xlane.xlu1 %2817 }
0x1784   : > { %v2819_v21 = vmul.f32 0.03125, %v2818_v48 }
0x1786   : > { %v2820_v50 = vadd.f32 1e-05, %v2819_v21 }
0x1788   : > { %6232 = vrsqrt.f32 %v2820_v50 }
0x1792   : > { %v6233_v56 = vpop.eup %6232 }
0x1793   : > { %v2822_v58 = vmul.f32 %v6233_v56, %v2814_v9  ;;  %v6996_v56 = vrot.slane %v6757_v34, %v3009_v52 }
0x1795   : > { %v2827_v61 = vmul.f32 %v6958_v54, %v2822_v58 }
0x1797   : > { %v2832_v62 = vadd.f32 %v6961_v59, %v2827_v61 }
0x1799   : > { %5777 = vmatmul.mubr.msk.f32.vlgmr.msra.gmra.mrb[28].mxu0 %vm598_vm1, %v2832_v62 }
0x179a   : > { %6054 = vmatpush3.bf16.msra.mxu0 %v6541_v5  ;;  %5806 = vmatprep.mubr.msk.f32.mxu0 %vm6349_vm0, %v6350_v1  ;;  %v6982_v5 = vld [vmem:[#allocation2] ss:$0 sm:$0xff] }
0x179b   : > { %6055 = vmatprep.subr.bf16.mxu0 %v6348_v0 }
0x179e   : > { %6057 = vmatpush3.bf16.msra.mxu0 %v6560_v11 }
0x179f   : > { %5809 = vmatprep.subr.mxu0 %v6350_v1 }
0x186c   : > { %v2908_v6 = vpop.f32.mrb[28].mxu0 }
0x186d   : > { %v2909_v11 = vadd.f32 %v6982_v5, %v2908_v6  ;;  %v5778_v9 = vpop.f32.mrb[29].mxu0 }
0x186f   : > { %v2912_v10 = vmax.f32 %v2909_v11, 0.0 }
0x1871   : > { %5796 = vmatmul.mubr.msk.f32.vlgmr.msra.gmra.mrb[26].mxu1 %vm2919_vm5, %v2912_v10 }
0x1872   : > { %5816 = vmatprep.mubr.msk.f32.mxu1 %vm6349_vm0, %v6350_v1 }
0x1944   : > { %v2989_v15 = vpop.f32.mrb[26].mxu1 }
0x1945   : > { %v2990_v17 = vadd.f32 %v6988_v12, %v2989_v15  ;;  %v5797_v31 = vpop.f32.mrb[27].mxu1 }
0x1947   : > { %v2993_v23 = vadd.f32 %v2990_v17, %v2832_v62  ;;  %v6999_v62 = vrot.slane %v6757_v34, %v3014_v53 }
0x1949   : > { %v2994_v30 = vsel %vm598_vm1, %v2993_v23, 0.0 }
0x194a   : > { %2995 = vadd.xlane.f32.xlu0 %v2994_v30 }
0x19d7   : > { %v2996_v32 = vpop.xlane.xlu0 %2995 }
0x19d8   : > { %v2997_v36 = vmul.f32 0.03125, %v2996_v32 }
0x19da   : > { %v2998_v40 = vsub.f32 %v2993_v23, %v2997_v36 }
0x19dc   : > { %v2999_v43 = vmul.f32 %v2998_v40, %v2998_v40 }
0x19de   : > { %v3000_v44 = vsel %vm598_vm1, %v2999_v43, 0.0 }
0x19df   : > { %3001 = vadd.xlane.f32.xlu0 %v3000_v44 }
0x1a6c   : > { %v3002_v48 = vpop.xlane.xlu0 %3001 }
0x1a6d   : > { %v3003_v21 = vmul.f32 0.03125, %v3002_v48 }
0x1a6f   : > { %v3004_v50 = vadd.f32 1e-05, %v3003_v21 }
0x1a71   : > { %6234 = vrsqrt.f32 %v3004_v50 }
0x1a7b   : > { %v6235_v58 = vpop.eup %6234 }
0x1a7c   : > { %v3006_v61 = vmul.f32 %v6235_v58, %v2998_v40 }
0x1a7e   : > { %v3011_v51 = vmul.f32 %v6996_v56, %v3006_v61 }
0x1a80   : > { %v7003_v3 = vadd.f32 %v6999_v62, %v3011_v51 }
0x1a82   : > { %5807 = vmatmul.mubr.msk.f32.vlgmr.msra.gmra.mrb[30].mxu0 %vm598_vm1, %v7003_v3 }
0x1a83   : > { %5811 = vmatprep.mubr.msk.f32.mxu0 %vm6349_vm0, %v6350_v1 }
0x1b55   : > { %v3086_v20 = vpop.f32.mrb[30].mxu0 }
0x1b56   : > { %v7010_v6 = vadd.f32 %v6594_v27, %v3086_v20  ;;  %v5808_v11 = vpop.f32.mrb[31].mxu0 }
0x1b58   : > { %3258 = vrot.lane.b32.xlu1 %v7010_v6, %s6352_s25  ;;  %3092 = vrot.lane.b32.xlu0 %v7010_v6, %s6351_s21  ;;  %v7017_v34 = vmul.f32 0.35355338, %v7010_v6  ;;  %s7267_s21 = smov 80   ;;  %s7268_s25 = smov 112  }
0x1b5c   : > { %3256 = vrot.lane.b32.xlu0 %v7017_v34, %s6353_s29 }
0x1bca   : > { %v3093_v9 = vpop.permute.xlu0 %3092  ;;  %v3259_v27 = vpop.permute.xlu1 %3258 }
0x1bcb   : > { %5810 = vmatpush3.xpose.msk.msra.mxu0 %vm763_vm2, %v3093_v9 }
0x1bcc   : > { %5819 = vmatprep.subr.mxu0 %v6350_v1 }
0x1bce   : > { %5812 = vmatmul.mubr.msk.f32.vlgmr.msra.gmra.mrb[32].mxu0 %vm763_vm2, %v7017_v34  ;;  %v3257_v10 = vpop.permute.xlu0 %3256 }
0x1bcf   : > { %5820 = vmatpush3.xpose.msk.msra.mxu0 %vm763_vm2, %v3259_v27  ;;  %5821 = vmatprep.mubr.msk.f32.mxu0 %vm6349_vm0, %v6350_v1 }
0x1bd0   : > { %5829 = vmatprep.subr.mxu0 %v6350_v1 }
0x1bd2   : > { %5822 = vmatmul.mubr.msk.f32.vlgmr.msra.gmra.mrb[34].mxu0 %vm763_vm2, %v3257_v10 }
0x1bd3   : > { %5830 = vmatpush3.msra.mxu0 %v6643_v60  ;;  %5831 = vmatprep.mubr.msk.f32.mxu0 %vm6349_vm0, %v6350_v1 }
0x1bd4   : > { %5839 = vmatprep.subr.mxu0 %v6350_v1 }
0x1ca1   : > { %v3165_v15 = vpop.f32.mrb[32].mxu0 }
0x1ca2   : > { %v5813_v17 = vpop.f32.mrb[33].mxu0  ;;  %v3169_v31 = vsel %vm763_vm2, %v3165_v15, -inf }
0x1ca3   : > { %3170 = vmax.xlane.f32.xlu1 %v3169_v31 }
0x1ca5   : > { %v3330_v23 = vpop.f32.mrb[34].mxu0 }
0x1ca6   : > { %v5823_v30 = vpop.f32.mrb[35].mxu0  ;;  %v3334_v32 = vsel %vm763_vm2, %v3330_v23, -inf }
0x1ca7   : > { %3335 = vmax.xlane.f32.xlu0 %v3334_v32 }
0x1d30   : > { %v3171_v36 = vpop.xlane.xlu1 %3170 }
0x1d31   : > { %v3172_v40 = vsub.f32 %v3165_v15, %v3171_v36 }
0x1d33   : > { %v3173_v43 = vmul.f32 1.442695, %v3172_v40 }
0x1d34   : > { %v3336_v44 = vpop.xlane.xlu0 %3335 }
0x1d35   : > { %6236 = vpow2.f32 %v3173_v43  ;;  %v3337_v60 = vsub.f32 %v3330_v23, %v3336_v44 }
0x1d37   : > { %v3338_v48 = vmul.f32 1.442695, %v3337_v60 }
0x1d39   : > { %6238 = vpow2.f32 %v3338_v48 }
0x1d3f   : > { %v6237_v21 = vpop.eup %6236 }
0x1d40   : > { %v3175_v50 = vsel %vm763_vm2, %v6237_v21, 0.0 }
0x1d41   : > { %3176 = vadd.xlane.f32.xlu0 %v3175_v50 }
0x1d43   : > { %v6239_v52 = vpop.eup %6238 }
0x1d44   : > { %v3340_v53 = vsel %vm763_vm2, %v6239_v52, 0.0 }
0x1d45   : > { %3341 = vadd.xlane.f32.xlu1 %v3340_v53 }
0x1d56   : > { %3345 = vrot.lane.b32.xlu1 %v7010_v6, %s6355_s16  ;;  %s7270_s16 = smov 104  }
0x1d57   : > { %3180 = vrot.lane.b32.xlu0 %v7010_v6, %s6354_s30  ;;  %s7269_s30 = smov 72  }
0x1d5a   : > { %3569 = vrot.lane.b32.xlu1 %v7010_v6, %s7267_s21 }
0x1d5b   : > { %3567 = vrot.lane.b32.xlu0 %v7017_v34, %s7268_s25 }
0x1dce   : > { %v3177_v58 = vpop.xlane.xlu0 %3176 }
0x1dcf   : > { %6240 = vrcp.f32 %v3177_v58 }
0x1dd2   : > { %v3342_v61 = vpop.xlane.xlu1 %3341  ;;  %v3181_v51 = vpop.permute.xlu0 %3180 }
0x1dd3   : > { %6242 = vrcp.f32 %v3342_v61  ;;  %5815 = vmatpush3.msra.mxu1 %v3181_v51 }
0x1dd4   : > { %5824 = vmatprep.subr.mxu1 %v6350_v1 }
0x1dd6   : > { %v3346_v9 = vpop.permute.xlu1 %3345 }
0x1dd9   : > { %v6241_v20 = vpop.eup %6240 }
0x1dda   : > { %v3179_v11 = vmul.f32 %v6241_v20, %v6237_v21  ;;  %v3570_v23 = vpop.permute.xlu1 %3569 }
0x1ddc   : > { %5817 = vmatmul.mubr.msk.f32.vlgmr.msra.gmra.mrb[28].mxu1 %vm763_vm2, %v3179_v11 }
0x1ddd   : > { %v6243_v27 = vpop.eup %6242  ;;  %5825 = vmatpush3.msra.mxu1 %v3346_v9  ;;  %5826 = vmatprep.mubr.msk.f32.mxu1 %vm6349_vm0, %v6350_v1 }
0x1dde   : > { %v3344_v10 = vmul.f32 %v6243_v27, %v6239_v52  ;;  %5834 = vmatprep.subr.mxu1 %v6350_v1 }
0x1de0   : > { %5827 = vmatmul.mubr.msk.f32.vlgmr.msra.gmra.mrb[30].mxu1 %vm763_vm2, %v3344_v10 }
0x1de1   : > { %5835 = vmatpush3.msra.mxu1 %v6650_v2  ;;  %5836 = vmatprep.mubr.msk.f32.mxu1 %vm6349_vm0, %v6350_v1  ;;  %v3568_v2 = vpop.permute.xlu0 %3567 }
0x1de2   : > { %5844 = vmatprep.subr.mxu1 %v6350_v1 }
0x1eaf   : > { %v3252_v15 = vpop.f32.mrb[28].mxu1 }
0x1eb0   : > { %v5818_v17 = vpop.f32.mrb[29].mxu1  ;;  %5837 = vmatmul.mubr.msk.f32.vlgmr.msra.gmra.mrb[32].mxu1 %vm763_vm2, %v3252_v15 }
0x1eb1   : > { %5846 = vmatprep.mubr.msk.f32.mxu1 %vm6349_vm0, %v6350_v1 }
0x1eb3   : > { %v3417_v31 = vpop.f32.mrb[30].mxu1 }
0x1eb4   : > { %v5828_v30 = vpop.f32.mrb[31].mxu1  ;;  %5832 = vmatmul.mubr.msk.f32.vlgmr.msra.gmra.mrb[36].mxu0 %vm763_vm2, %v3417_v31 }
0x1eb5   : > { %5840 = vmatpush3.xpose.msk.msra.mxu0 %vm763_vm2, %v3570_v23  ;;  %5841 = vmatprep.mubr.msk.f32.mxu0 %vm6349_vm0, %v6350_v1 }
0x1eb6   : > { %5849 = vmatprep.subr.mxu0 %v6350_v1 }
0x1eb8   : > { %5842 = vmatmul.mubr.msk.f32.vlgmr.msra.gmra.mrb[38].mxu0 %vm763_vm2, %v3568_v2 }
0x1eb9   : > { %5850 = vmatpush3.msra.mxu0 %v6688_v35  ;;  %5851 = vmatprep.mubr.msk.f32.mxu0 %vm6349_vm0, %v6350_v1 }
0x1eba   : > { %5859 = vmatprep.subr.mxu0 %v6350_v1 }
0x1f83   : > { %v3563_v32 = vpop.f32.mrb[32].mxu1 }
0x1f84   : > { %v5838_v36 = vpop.f32.mrb[33].mxu1 }
0x1f87   : > { %v3490_v40 = vpop.f32.mrb[36].mxu0 }
0x1f88   : > { %v3564_v43 = vadd.f32 %v3563_v32, %v3490_v40  ;;  %v5833_v44 = vpop.f32.mrb[37].mxu0 }
0x1f8b   : > { %v3641_v60 = vpop.f32.mrb[38].mxu0 }
0x1f8c   : > { %v5843_v48 = vpop.f32.mrb[39].mxu0  ;;  %v3645_v21 = vsel %vm763_vm2, %v3641_v60, -inf }
0x1f8d   : > { %3646 = vmax.xlane.f32.xlu1 %v3645_v21 }
0x1f9e   : > { %3808 = vrot.lane.b32.xlu1 %v7010_v6, %s7269_s30 }
0x1fa2   : > { %3806 = vrot.lane.b32.xlu1 %v7017_v34, %s7270_s16 }
0x201a   : > { %v3647_v35 = vpop.xlane.xlu1 %3646 }
0x201b   : > { %v3648_v50 = vsub.f32 %v3641_v60, %v3647_v35 }
0x201d   : > { %v3649_v52 = vmul.f32 1.442695, %v3648_v50 }
0x201e   : > { %v3809_v11 = vpop.permute.xlu1 %3808 }
0x201f   : > { %6244 = vpow2.f32 %v3649_v52 }
0x2022   : > { %v3807_v9 = vpop.permute.xlu1 %3806 }
0x2029   : > { %v6245_v53 = vpop.eup %6244 }
0x202a   : > { %v3651_v58 = vsel %vm763_vm2, %v6245_v53, 0.0 }
0x202b   : > { %3652 = vadd.xlane.f32.xlu0 %v3651_v58 }
0x2041   : > { %3656 = vrot.lane.b32.xlu0 %v7010_v6, %s7271_s23 }
0x20b8   : > { %v3653_v61 = vpop.xlane.xlu0 %3652 }
0x20b9   : > { %6246 = vrcp.f32 %v3653_v61 }
0x20bc   : > { %v3657_v51 = vpop.permute.xlu0 %3656 }
0x20bd   : > { %5845 = vmatpush3.msra.mxu1 %v3657_v51 }
0x20be   : > { %5854 = vmatprep.subr.mxu1 %v6350_v1 }
0x20c3   : > { %v6247_v20 = vpop.eup %6246 }
0x20c4   : > { %v3655_v34 = vmul.f32 %v6247_v20, %v6245_v53 }
0x20c6   : > { %5847 = vmatmul.mubr.msk.f32.vlgmr.msra.gmra.mrb[34].mxu1 %vm763_vm2, %v3655_v34 }
0x20c7   : > { %5855 = vmatpush3.xpose.msk.msra.mxu1 %vm763_vm2, %v3809_v11  ;;  %5856 = vmatprep.mubr.msk.f32.mxu1 %vm6349_vm0, %v6350_v1 }
0x20c8   : > { %5864 = vmatprep.subr.mxu1 %v6350_v1 }
0x20ca   : > { %5857 = vmatmul.mubr.msk.f32.vlgmr.msra.gmra.mrb[36].mxu1 %vm763_vm2, %v3807_v9 }
0x20cb   : > { %5865 = vmatpush3.msra.mxu1 %v6703_v47  ;;  %5866 = vmatprep.mubr.msk.f32.mxu1 %vm6349_vm0, %v6350_v1 }
0x20cc   : > { %6064 = vmatprep.subr.bf16.mxu1 %v6348_v0 }
0x2199   : > { %v3728_v27 = vpop.f32.mrb[34].mxu1 }
0x219a   : > { %v5848_v10 = vpop.f32.mrb[35].mxu1  ;;  %5852 = vmatmul.mubr.msk.f32.vlgmr.msra.gmra.mrb[40].mxu0 %vm763_vm2, %v3728_v27 }
0x219b   : > { %5861 = vmatprep.mubr.msk.f32.mxu0 %vm6349_vm0, %v6350_v1 }
0x219d   : > { %v3880_v15 = vpop.f32.mrb[36].mxu1 }
0x219e   : > { %v5858_v17 = vpop.f32.mrb[37].mxu1  ;;  %v3884_v31 = vsel %vm763_vm2, %v3880_v15, -inf }
0x219f   : > { %3885 = vmax.xlane.f32.xlu0 %v3884_v31 }
0x21b5   : > { %3895 = vrot.lane.b32.xlu0 %v7010_v6, %s7272_s27 }
0x222c   : > { %v3886_v47 = vpop.xlane.xlu0 %3885 }
0x222d   : > { %v3887_v23 = vsub.f32 %v3880_v15, %v3886_v47 }
0x222f   : > { %v3888_v30 = vmul.f32 1.442695, %v3887_v23 }
0x2230   : > { %v3896_v2 = vpop.permute.xlu0 %3895 }
0x2231   : > { %6248 = vpow2.f32 %v3888_v30  ;;  %5860 = vmatpush3.msra.mxu0 %v3896_v2 }
0x2232   : > { %6058 = vmatprep.subr.bf16.mxu0 %v6348_v0 }
0x223b   : > { %v6249_v32 = vpop.eup %6248 }
0x223c   : > { %v3890_v36 = vsel %vm763_vm2, %v6249_v32, 0.0 }
0x223d   : > { %3891 = vadd.xlane.f32.xlu1 %v3890_v36 }
0x226d   : > { %v3801_v40 = vpop.f32.mrb[40].mxu0 }
0x226e   : > { %v3805_v44 = vadd.f32 %v3801_v40, %v3564_v43  ;;  %v5853_v60 = vpop.f32.mrb[41].mxu0 }
0x22ca   : > { %v3892_v48 = vpop.xlane.xlu1 %3891 }
0x22cb   : > { %6250 = vrcp.f32 %v3892_v48 }
0x22d5   : > { %v6251_v21 = vpop.eup %6250 }
0x22d6   : > { %v3894_v35 = vmul.f32 %v6251_v21, %v6249_v32 }
0x22d8   : > { %5862 = vmatmul.mubr.msk.f32.vlgmr.msra.gmra.mrb[42].mxu0 %vm763_vm2, %v3894_v35 }
0x22d9   : > { %6060 = vmatpush3.bf16.msra.mxu0 %v6562_v13  ;;  %5877 = vmatprep.mubr.msk.f32.mxu0 %vm6349_vm0, %v6350_v1 }
0x22da   : > { %6061 = vmatprep.subr.bf16.mxu0 %v6348_v0 }
0x22dd   : > { %6063 = vmatpush3.bf16.msra.mxu0 %v6564_v14 }
0x22de   : > { %6068 = vmatprep.subr.bf16.mxu0 %v6348_v0 }
0x23ab   : > { %v3967_v6 = vpop.f32.mrb[42].mxu0 }
0x23ac   : > { %v5863_v43 = vpop.f32.mrb[43].mxu0  ;;  %5867 = vmatmul.mubr.msk.f32.vlgmr.msra.gmra.mrb[38].mxu1 %vm763_vm2, %v3967_v6 }
0x23ad   : > { %6067 = vmatpush3.bf16.xpose.msk.msra.mxu1 %vm6737_vm3, %v6745_v22  ;;  %5884 = vmatprep.mubr.msk.f32.mxu1 %vm6349_vm0, %v6350_v1 }
0x23ae   : > { %6071 = vmatprep.subr.bf16.mxu1 %v6348_v0 }
0x247f   : > { %v4040_v13 = vpop.f32.mrb[38].mxu1 }
0x2480   : > { %v4044_v50 = vadd.f32 %v4040_v13, %v3805_v44  ;;  %v5868_v52 = vpop.f32.mrb[39].mxu1 }
0x2482   : > { %v4045_v14 = vadd.f32 %v6720_v55, %v4044_v50 }
0x2484   : > { %v4046_v53 = vadd.f32 %v4045_v14, %v7003_v3 }
0x2486   : > { %v4047_v58 = vsel %vm598_vm1, %v4046_v53, 0.0 }
0x2487   : > { %4048 = vadd.xlane.f32.xlu1 %v4047_v58 }
0x2514   : > { %v4049_v61 = vpop.xlane.xlu1 %4048 }
0x2515   : > { %v4050_v51 = vmul.f32 0.03125, %v4049_v61 }
0x2517   : > { %v4051_v20 = vsub.f32 %v4046_v53, %v4050_v51 }
0x2519   : > { %v4052_v11 = vmul.f32 %v4051_v20, %v4051_v20 }
0x251b   : > { %v4053_v22 = vsel %vm598_vm1, %v4052_v11, 0.0 }
0x251c   : > { %4054 = vadd.xlane.f32.xlu1 %v4053_v22 }
0x25a9   : > { %v4055_v34 = vpop.xlane.xlu1 %4054 }
0x25aa   : > { %v4056_v9 = vmul.f32 0.03125, %v4055_v34 }
0x25ac   : > { %v4057_v27 = vadd.f32 1e-05, %v4056_v9 }
0x25ae   : > { %6252 = vrsqrt.f32 %v4057_v27 }
0x25b8   : > { %v6253_v10 = vpop.eup %6252 }
0x25b9   : > { %v4059_v15 = vmul.f32 %v6253_v10, %v4051_v20 }
0x25bb   : > { %v4060_v55 = vmul.f32 %v4059_v15, %v6761_v24 }
0x25bd   : > { %v7116_v3 = vadd.f32 %v4060_v55, %v6764_v28 }
0x25bf   : > { %5878 = vmatmul.mubr.msk.f32.vlgmr.msra.gmra.mrb[44].mxu0 %vm598_vm1, %v7116_v3 }
0x25c0   : > { %6070 = vmatpush3.bf16.msra.mxu0 %v6797_v63  ;;  %5891 = vmatprep.mubr.msk.f32.mxu0 %vm6349_vm0, %v6350_v1 }
0x25c1   : > { %6075 = vmatprep.subr.bf16.mxu0 %v6348_v0 }
0x2692   : > { %v4131_v17 = vpop.f32.mrb[44].mxu0 }
0x2693   : > { %v4132_v31 = vadd.f32 %v6729_v8, %v4131_v17  ;;  %v5879_v47 = vpop.f32.mrb[45].mxu0 }
0x2695   : > { %v4135_v23 = vmul.f32 0.35355338, %v4132_v31 }
0x2697   : > { %4293 = vrot.lane.b32.xlu1 %v4135_v23, %s6353_s29  ;;  %5885 = vmatmul.mubr.msk.f32.vlgmr.msra.gmra.mrb[40].mxu1 %vm763_vm2, %v4135_v23  ;;  %s7273_s29 = sshll.u32 %s7275_s19, 3 }
0x2698   : > { %6074 = vmatpush3.bf16.xpose.msk.msra.mxu1 %vm6737_vm3, %v6775_v42  ;;  %5898 = vmatprep.mubr.msk.f32.mxu1 %vm6349_vm0, %v6350_v1  ;;  %s535_s24 = scalar_lea.vmem %s7246_s15, %s7273_s29 }
0x2699   : > { %5913 = vmatprep.subr.mxu1 %v6350_v1 }
0x2709   : > { %v4294_v24 = vpop.permute.xlu1 %4293 }
0x270a   : > { %5899 = vmatmul.mubr.msk.f32.vlgmr.msra.gmra.mrb[42].mxu1 %vm763_vm2, %v4294_v24 }
0x270b   : > { %5914 = vmatpush3.msra.mxu1 %v6812_v16  ;;  %5915 = vmatprep.mubr.msk.f32.mxu1 %vm6349_vm0, %v6350_v1 }
0x270c   : > { %6082 = vmatprep.subr.bf16.mxu1 %v6348_v0 }
0x276a   : > { %v4205_v8 = vpop.f32.mrb[40].mxu1 }
0x276b   : > { %v5886_v28 = vpop.f32.mrb[41].mxu1  ;;  %v4209_v63 = vsel %vm1901_vm4, %v4205_v8, -inf }
0x276c   : > { %4210 = vmax.xlane.f32.xlu0 %v4209_v63 }
0x27dd   : > { %v4363_v42 = vpop.f32.mrb[42].mxu1 }
0x27de   : > { %v5900_v30 = vpop.f32.mrb[43].mxu1  ;;  %v4367_v2 = vsel %vm1901_vm4, %v4363_v42, -inf }
0x27df   : > { %4368 = vmax.xlane.f32.xlu1 %v4367_v2 }
0x27f0   : > { %4829 = vrot.lane.b32.xlu1 %v4135_v23, %s7270_s16 }
0x27f9   : > { %v4211_v32 = vpop.xlane.xlu0 %4210 }
0x27fa   : > { %v4212_v36 = vsub.f32 %v4205_v8, %v4211_v32 }
0x27fc   : > { %v4213_v16 = vmul.f32 1.442695, %v4212_v36 }
0x27fe   : > { %6254 = vpow2.f32 %v4213_v16 }
0x2808   : > { %v6255_v40 = vpop.eup %6254 }
0x2809   : > { %v4215_v44 = vsel %vm1901_vm4, %v6255_v40, 0.0 }
0x280a   : > { %4216 = vadd.xlane.f32.xlu0 %v4215_v44 }
0x286c   : > { %v4369_v60 = vpop.xlane.xlu1 %4368 }
0x286d   : > { %v4370_v48 = vsub.f32 %v4363_v42, %v4369_v60 }
0x286f   : > { %v4371_v21 = vmul.f32 1.442695, %v4370_v48 }
0x2871   : > { %6256 = vpow2.f32 %v4371_v21 }
0x287b   : > { %v6257_v35 = vpop.eup %6256 }
0x287c   : > { %v4373_v6 = vsel %vm1901_vm4, %v6257_v35, 0.0 }
0x287d   : > { %4374 = vadd.xlane.f32.xlu0 %v4373_v6 }
0x2893   : > { %4597 = vrot.lane.b32.xlu0 %v4135_v23, %s7268_s25 }
0x2897   : > { %v4217_v43 = vpop.xlane.xlu0 %4216 }
0x2898   : > { %6258 = vrcp.f32 %v4217_v43 }
0x28a2   : > { %v6259_v13 = vpop.eup %6258 }
0x28a3   : > { %v4219_v50 = vmul.f32 %v6259_v13, %v6255_v40 }
0x28a5   : > { %5892 = vmatmul.mubr.msk.f32.vlgmr.msra.gmra.mrb[46].mxu0 %vm1901_vm4, %v4219_v50 }
0x28a6   : > { %6077 = vmatpush3.bf16.msra.mxu0 %v6816_v18  ;;  %5905 = vmatprep.mubr.msk.f32.mxu0 %vm6349_vm0, %v6350_v1 }
0x28a7   : > { %5908 = vmatprep.subr.mxu0 %v6350_v1 }
0x290a   : > { %v4375_v52 = vpop.xlane.xlu0 %4374 }
0x290b   : > { %6260 = vrcp.f32 %v4375_v52 }
0x2915   : > { %v6261_v14 = vpop.eup %6260 }
0x2916   : > { %v4377_v53 = vmul.f32 %v6261_v14, %v6257_v35 }
0x2918   : > { %5906 = vmatmul.mubr.msk.f32.vlgmr.msra.gmra.mrb[48].mxu0 %vm1901_vm4, %v4377_v53 }
0x2919   : > { %5909 = vmatpush3.msra.mxu0 %v6823_v25  ;;  %5910 = vmatprep.mubr.msk.f32.mxu0 %vm6349_vm0, %v6350_v1  ;;  %v4598_v25 = vpop.permute.xlu0 %4597 }
0x291a   : > { %6078 = vmatprep.subr.bf16.mxu0 %v6348_v0 }
0x2978   : > { %v4289_v58 = vpop.f32.mrb[46].mxu0 }
0x2979   : > { %v5893_v18 = vpop.f32.mrb[47].mxu0  ;;  %5916 = vmatmul.mubr.msk.f32.vlgmr.msra.gmra.mrb[44].mxu1 %vm763_vm2, %v4289_v58 }
0x297a   : > { %6084 = vmatpush3.bf16.msra.mxu1 %v6857_v7  ;;  %5929 = vmatprep.mubr.msk.f32.mxu1 %vm6349_vm0, %v6350_v1  ;;  %v4830_v7 = vpop.permute.xlu1 %4829 }
0x297b   : > { %5932 = vmatprep.subr.mxu1 %v6350_v1 }
0x29eb   : > { %v4447_v61 = vpop.f32.mrb[48].mxu0 }
0x29ec   : > { %v5907_v51 = vpop.f32.mrb[49].mxu0  ;;  %5911 = vmatmul.mubr.msk.f32.vlgmr.msra.gmra.mrb[50].mxu0 %vm763_vm2, %v4447_v61 }
0x29ed   : > { %6081 = vmatpush3.bf16.xpose.msk.msra.mxu0 %vm6737_vm3, %v6833_v38  ;;  %5922 = vmatprep.mubr.msk.f32.mxu0 %vm6349_vm0, %v6350_v1 }
0x29ee   : > { %6085 = vmatprep.subr.bf16.mxu0 %v6348_v0 }
0x29f4   : > { %5923 = vmatmul.mubr.msk.f32.vlgmr.msra.gmra.mrb[52].mxu0 %vm763_vm2, %v4598_v25 }
0x29f5   : > { %6088 = vmatpush3.bf16.xpose.msk.msra.mxu0 %vm6737_vm3, %v6842_v46  ;;  %5941 = vmatprep.mubr.msk.f32.mxu0 %vm6349_vm0, %v6350_v1 }
0x29f6   : > { %6092 = vmatprep.subr.bf16.mxu0 %v6348_v0 }
0x29fc   : > { %5942 = vmatmul.mubr.msk.f32.vlgmr.msra.gmra.mrb[54].mxu0 %vm763_vm2, %v4830_v7 }
0x29fd   : > { %6094 = vmatpush3.bf16.msra.mxu0 %v6911_v33  ;;  %5964 = vmatprep.mubr.msk.f32.mxu0 %vm6349_vm0, %v6350_v1 }
0x29fe   : > { %6095 = vmatprep.subr.bf16.mxu0 %v6348_v0 }
0x2a01   : > { %6097 = vmatpush3.bf16.msra.mxu0 %v6921_v26 }
0x2a4c   : > { %v4593_v38 = vpop.f32.mrb[44].mxu1 }
0x2a4d   : > { %v5917_v19 = vpop.f32.mrb[45].mxu1 }
0x2abf   : > { %v4520_v46 = vpop.f32.mrb[50].mxu0 }
0x2ac0   : > { %v4594_v20 = vadd.f32 %v4593_v38, %v4520_v46  ;;  %v5912_v11 = vpop.f32.mrb[51].mxu0 }
0x2ac7   : > { %v4667_v22 = vpop.f32.mrb[52].mxu0 }
0x2ac8   : > { %v5924_v34 = vpop.f32.mrb[53].mxu0  ;;  %v4671_v9 = vsel %vm1901_vm4, %v4667_v22, -inf }
0x2ac9   : > { %4672 = vmax.xlane.f32.xlu0 %v4671_v9 }
0x2acf   : > { %v4899_v27 = vpop.f32.mrb[54].mxu0 }
0x2ad0   : > { %v5943_v10 = vpop.f32.mrb[55].mxu0  ;;  %v4903_v33 = vsel %vm1901_vm4, %v4899_v27, -inf }
0x2ad1   : > { %4904 = vmax.xlane.f32.xlu0 %v4903_v33 }
0x2b56   : > { %v4673_v15 = vpop.xlane.xlu0 %4672 }
0x2b57   : > { %v4674_v55 = vsub.f32 %v4667_v22, %v4673_v15 }
0x2b59   : > { %v4675_v17 = vmul.f32 1.442695, %v4674_v55 }
0x2b5b   : > { %6262 = vpow2.f32 %v4675_v17 }
0x2b5e   : > { %v4905_v26 = vpop.xlane.xlu0 %4904 }
0x2b5f   : > { %v4906_v31 = vsub.f32 %v4899_v27, %v4905_v26 }
0x2b61   : > { %v4907_v47 = vmul.f32 1.442695, %v4906_v31 }
0x2b63   : > { %6264 = vpow2.f32 %v4907_v47 }
0x2b65   : > { %v6263_v23 = vpop.eup %6262 }
0x2b66   : > { %v4677_v24 = vsel %vm1901_vm4, %v6263_v23, 0.0 }
0x2b67   : > { %4678 = vadd.xlane.f32.xlu1 %v4677_v24 }
0x2b6d   : > { %v6265_v8 = vpop.eup %6264 }
0x2b6e   : > { %v4909_v28 = vsel %vm1901_vm4, %v6265_v8, 0.0 }
0x2b6f   : > { %4910 = vadd.xlane.f32.xlu0 %v4909_v28 }
0x2bf4   : > { %v4679_v63 = vpop.xlane.xlu1 %4678 }
0x2bf5   : > { %6266 = vrcp.f32 %v4679_v63 }
0x2bfc   : > { %v4911_v2 = vpop.xlane.xlu0 %4910 }
0x2bfd   : > { %6268 = vrcp.f32 %v4911_v2 }
0x2bff   : > { %v6267_v42 = vpop.eup %6266 }
0x2c00   : > { %v4681_v30 = vmul.f32 %v6267_v42, %v6263_v23 }
0x2c02   : > { %5930 = vmatmul.mubr.msk.f32.vlgmr.msra.gmra.mrb[46].mxu1 %vm1901_vm4, %v4681_v30 }
0x2c03   : > { %5933 = vmatpush3.msra.mxu1 %v6872_v37  ;;  %5934 = vmatprep.mubr.msk.f32.mxu1 %vm6349_vm0, %v6350_v1 }
0x2c04   : > { %6089 = vmatprep.subr.bf16.mxu1 %v6348_v0 }
0x2c07   : > { %v6269_v32 = vpop.eup %6268 }
0x2c08   : > { %v4913_v40 = vmul.f32 %v6269_v32, %v6265_v8 }
0x2cd5   : > { %v4751_v36 = vpop.f32.mrb[46].mxu1 }
0x2cd6   : > { %v5931_v16 = vpop.f32.mrb[47].mxu1  ;;  %5935 = vmatmul.mubr.msk.f32.vlgmr.msra.gmra.mrb[48].mxu1 %vm763_vm2, %v4751_v36 }
0x2cd7   : > { %6091 = vmatpush3.bf16.msra.mxu1 %v6876_v45  ;;  %5948 = vmatprep.mubr.msk.f32.mxu1 %vm6349_vm0, %v6350_v1 }
0x2cd8   : > { %5951 = vmatprep.subr.mxu1 %v6350_v1 }
0x2cda   : > { %5949 = vmatmul.mubr.msk.f32.vlgmr.msra.gmra.mrb[50].mxu1 %vm1901_vm4, %v4913_v40 }
0x2cdb   : > { %5952 = vmatpush3.msra.mxu1 %v6889_v49  ;;  %5953 = vmatprep.mubr.msk.f32.mxu1 %vm6349_vm0, %v6350_v1 }
0x2cdc   : > { %6098 = vmatprep.subr.bf16.mxu1 %v6348_v0 }
0x2da9   : > { %v4824_v37 = vpop.f32.mrb[48].mxu1 }
0x2daa   : > { %v4828_v44 = vadd.f32 %v4824_v37, %v4594_v20  ;;  %v5936_v60 = vpop.f32.mrb[49].mxu1 }
0x2dad   : > { %v4983_v48 = vpop.f32.mrb[50].mxu1 }
0x2dae   : > { %v5950_v45 = vpop.f32.mrb[51].mxu1  ;;  %5954 = vmatmul.mubr.msk.f32.vlgmr.msra.gmra.mrb[52].mxu1 %vm763_vm2, %v4983_v48 }
0x2daf   : > { %6100 = vmatpush3.bf16.msra.mxu1 %v6934_v39  ;;  %5983 = vmatprep.mubr.msk.f32.mxu1 %vm6349_vm0, %v6350_v1 }
0x2db0   : > { %6101 = vmatprep.subr.bf16.mxu1 %v6348_v0 }
0x2db3   : > { %6103 = vmatpush3.bf16.msra.mxu1 %v6940_v41 }
0x2db4   : > { %6104 = vmatprep.subr.bf16.mxu1 %v6348_v0 }
0x2db7   : > { %6106 = vmatpush3.bf16.msra.mxu1 %v6950_v29 }
0x2db8   : > { %6107 = vmatprep.subr.bf16.mxu1 %v6348_v0 }
0x2dbb   : > { %6109 = vmatpush3.bf16.msra.mxu1 %v6978_v4 }
0x2e81   : > { %v5056_v49 = vpop.f32.mrb[52].mxu1 }
0x2e82   : > { %v5060_v21 = vadd.f32 %v5056_v49, %v4828_v44  ;;  %v5955_v35 = vpop.f32.mrb[53].mxu1 }
0x2e84   : > { %v5061_v39 = vadd.f32 %v6899_v57, %v5060_v21 }
0x2e86   : > { %v5062_v6 = vadd.f32 %v5061_v39, %v7116_v3 }
0x2e88   : > { %v5063_v1 = vsel %vm598_vm1, %v5062_v6, 0.0 }
0x2e89   : > { %5064 = vadd.xlane.f32.xlu1 %v5063_v1 }
0x2f16   : > { %v5065_v43 = vpop.xlane.xlu1 %5064 }
0x2f17   : > { %v5066_v41 = vmul.f32 0.03125, %v5065_v43 }
0x2f19   : > { %v5067_v13 = vsub.f32 %v5062_v6, %v5066_v41 }
0x2f1b   : > { %v5068_v50 = vmul.f32 %v5067_v13, %v5067_v13 }
0x2f1d   : > { %v5069_v29 = vsel %vm598_vm1, %v5068_v50, 0.0 }
0x2f1e   : > { %5070 = vadd.xlane.f32.xlu0 %v5069_v29 }
0x2fab   : > { %v5071_v0 = vpop.xlane.xlu0 %5070 }
0x2fac   : > { %v5072_v52 = vmul.f32 0.03125, %v5071_v0 }
0x2fae   : > { %v5073_v4 = vadd.f32 1e-05, %v5072_v52 }
0x2fb0   : > { %6270 = vrsqrt.f32 %v5073_v4 }
0x2fba   : > { %v6271_v14 = vpop.eup %6270 }
0x2fbb   : > { %v5075_v53 = vmul.f32 %v6271_v14, %v5067_v13 }
0x2fbd   : > { %v5076_v57 = vmul.f32 %v5075_v53, %v6958_v54 }
0x2fbf   : > { %v5077_v3 = vadd.f32 %v5076_v57, %v6961_v59 }
0x2fc1   : > { %5965 = vmatmul.mubr.msk.f32.vlgmr.msra.gmra.mrb[56].mxu0 %vm598_vm1, %v5077_v3 }
0x3094   : > { %v5147_v58 = vpop.f32.mrb[56].mxu0 }
0x3095   : > { %v5148_v18 = vadd.f32 %v6982_v5, %v5147_v58  ;;  %v5966_v61 = vpop.f32.mrb[57].mxu0 }
0x3097   : > { %v5151_v51 = vmax.f32 %v5148_v18, 0.0 }
0x3099   : > { %5984 = vmatmul.mubr.msk.f32.vlgmr.msra.gmra.mrb[54].mxu1 %vm2919_vm5, %v5151_v51 }
0x316c   : > { %v5221_v25 = vpop.f32.mrb[54].mxu1 }
0x316d   : > { %v5222_v7 = vadd.f32 %v6988_v12, %v5221_v25  ;;  %v5985_v38 = vpop.f32.mrb[55].mxu1 }
0x316f   : > { %v5225_v19 = vadd.f32 %v5222_v7, %v5077_v3 }
0x3171   : > { %v5226_v46 = vsel %vm598_vm1, %v5225_v19, 0.0 }
0x3172   : > { %5227 = vadd.xlane.f32.xlu1 %v5226_v46 }
0x31ff   : > { %v5228_v54 = vpop.xlane.xlu1 %5227 }
0x3200   : > { %v5229_v59 = vmul.f32 0.03125, %v5228_v54 }
0x3202   : > { %v5230_v20 = vsub.f32 %v5225_v19, %v5229_v59 }
0x3204   : > { %v5231_v11 = vmul.f32 %v5230_v20, %v5230_v20 }
0x3206   : > { %v5232_v22 = vsel %vm598_vm1, %v5231_v11, 0.0 }
0x3207   : > { %5233 = vadd.xlane.f32.xlu0 %v5232_v22 }
0x3294   : > { %v5234_v5 = vpop.xlane.xlu0 %5233 }
0x3295   : > { %v5235_v34 = vmul.f32 0.03125, %v5234_v5 }
0x3297   : > { %v5236_v9 = vadd.f32 1e-05, %v5235_v34 }
0x3299   : > { %6272 = vrsqrt.f32 %v5236_v9 }
0x32a3   : > { %v6273_v27 = vpop.eup %6272 }
0x32a4   : > { %v5238_v10 = vmul.f32 %v6273_v27, %v5230_v20 }
0x32a6   : > { %v5239_v12 = vmul.f32 %v5238_v10, %v6996_v56 }
0x32a8   : > { %v5240_v33 = vadd.f32 %v5239_v12, %v6999_v62 }
0x32aa   : > { %5241 = vst.msk [vmem:[%s535_s24] sm:$0xff] %vm598_vm1, %v5240_v33 }
0x32ab PF: > { %s27_s18 = sadd.s32 1, %s6344_s18  }
0x32ac   : > { %p24_p5 = scmp.ge.s32.totalorder %s27_s18, 4  }
0x32ae   :  { %26 = sbr.rel (!%p24_p5) target bundleno = 2 (0x2), region = 122 }
0x32b5   :  { %5261 = vsyncpa [#allocation3], 1 }
0x32b6   :  { %5263 = vsyncpa [#allocation3 + $0x1], 1 }
0x32b7   :  { %5264 = vsyncpa [#allocation5], 1 }

</bundles_post_ra>
